<compile_context>
chip_gen: v7x
topology: tpu7x:2x2x1
jax: 0.10.0
libtpu: 0.0.40
codegen_flags: <defaults>
</compile_context>

<pallas_src>
import functools

import numpy as np
import jax
import jax.numpy as jnp
from jax import lax
from jax.experimental import pallas as pl
from jax.experimental.pallas import tpu as pltpu


# ---------------------------------------------------------------------------
# In-kernel helpers (only 2-D iota, compares, static slices, dots, elementwise)
# ---------------------------------------------------------------------------
def _dot(a, b):
    return jnp.dot(a, b, preferred_element_type=jnp.float32)


def _row_sel(n_out, n_in):
    """(n_out, n_in) 0/1 matrix with M[k, 2k] = 1: left-multiply picks even rows."""
    r = lax.broadcasted_iota(jnp.int32, (n_out, n_in), 0)
    c = lax.broadcasted_iota(jnp.int32, (n_out, n_in), 1)
    return (c == 2 * r).astype(jnp.float32)


def _col_sel(n_in, n_out):
    """(n_in, n_out) 0/1 matrix with M[2k, k] = 1: right-multiply picks even lanes."""
    r = lax.broadcasted_iota(jnp.int32, (n_in, n_out), 0)
    c = lax.broadcasted_iota(jnp.int32, (n_in, n_out), 1)
    return (r == 2 * c).astype(jnp.float32)


def _max_pool_2x2_wide(a, n_ch, w):
    """2x2 / stride-2 max pool on the 'wide' layout a: (H, n_ch*w), lane = ch*w + x.

    Returns (H//2, n_ch*(w//2)) with lane = ch*(w//2) + x.  Columns that mix two
    channels (x == w-1) are never selected by the compaction matmul, so the
    neighbour-max contamination at channel boundaries is harmless.
    """
    H = a.shape[0]
    m = jnp.maximum(a[:, : n_ch * w - 1], a[:, 1:])      # max over (x, x+1)
    m = jnp.maximum(m[: H - 1, :], m[1:, :])             # max over (h, h+1)
    S = _row_sel(H // 2, H - 1)                          # pick rows 0,2,4,...
    E = _col_sel(n_ch * w - 1, n_ch * (w // 2))          # pick lanes 2q
    return _dot(_dot(S, m), E)


# ---------------------------------------------------------------------------
# The fused forward kernel (one image per grid step)
# ---------------------------------------------------------------------------
def _lenet_kernel(x_ref, w1b_ref, b1w_ref, w2b_ref, b2w_ref,
                  w1r_ref, b1f_ref, w2f_ref, b2f_ref, w3f_ref, b3f_ref,
                  out_ref):
    x = x_ref[0, 0]                                      # (28, 28), Cin = 1

    # ---- conv1 (5x5, 1->6) as 5 banded matmuls; output layout (24, 6*24) ----
    acc1 = _dot(x[0:24, :], w1b_ref[0])
    for i in range(1, 5):
        acc1 = acc1 + _dot(x[i:i + 24, :], w1b_ref[i])
    a1 = jnp.maximum(acc1 + b1w_ref[...], 0.0)           # (24, 144), lane = c*24+w

    # ---- pool1: 2x2 / stride 2 -> (12, 6*12) ----
    p1 = _max_pool_2x2_wide(a1, n_ch=6, w=24)            # (12, 72), lane = c*12+w

    # ---- conv2 (5x5, 6->16) as 30 banded matmuls; output layout (8, 16*8) ----
    acc2 = None
    for ci in range(6):
        lhs_c = p1[:, ci * 12:(ci + 1) * 12]             # (12, 12) channel ci
        for i in range(5):
            term = _dot(lhs_c[i:i + 8, :], w2b_ref[ci * 5 + i])
            acc2 = term if acc2 is None else acc2 + term
    a2 = jnp.maximum(acc2 + b2w_ref[...], 0.0)           # (8, 128), lane = co*8+w

    # ---- pool2 -> (4, 16*4) ----
    p2 = _max_pool_2x2_wide(a2, n_ch=16, w=8)            # (4, 64), lane = co*4+w

    # ---- fc1 (256->120): PyTorch (C,H,W) flatten folded into the weight layout ----
    y = _dot(p2[0:1, :], w1r_ref[0])
    for ph in range(1, 4):
        y = y + _dot(p2[ph:ph + 1, :], w1r_ref[ph])
    y = jnp.maximum(y + b1f_ref[...], 0.0)               # (1, 120)

    # ---- fc2 / fc3 ----
    y = jnp.maximum(_dot(y, w2f_ref[...]) + b2f_ref[...], 0.0)   # (1, 84)
    y = _dot(y, w3f_ref[...]) + b3f_ref[...]                     # (1, 10)

    # ---- log-softmax epilogue (numerically stable) ----
    m = jnp.max(y, axis=-1, keepdims=True)
    s = y - m
    lse = jnp.log(jnp.sum(jnp.exp(s), axis=-1, keepdims=True))
    out_ref[0] = (s - lse).astype(out_ref.dtype)


@jax.jit
def lenet_forward(kp, x_nchw):
    """x_nchw: (N, 1, 28, 28) float32 -> (N, 10) log-probabilities."""
    x = x_nchw.astype(jnp.float32)
    N = x.shape[0]

    weights = (kp["w1b"], kp["b1w"], kp["w2b"], kp["b2w"],
               kp["w1r"], kp["b1f"], kp["w2f"], kp["b2f"], kp["w3f"], kp["b3f"])

    def _full_spec(a):
        nd = a.ndim
        return pl.BlockSpec(a.shape, lambda b, _nd=nd: (0,) * _nd)

    in_specs = [pl.BlockSpec((1, 1, 28, 28), lambda b: (b, 0, 0, 0))]
    in_specs += [_full_spec(w) for w in weights]

    out = pl.pallas_call(
        _lenet_kernel,
        out_shape=jax.ShapeDtypeStruct((N, 1, 10), jnp.float32),
        grid=(N,),
        in_specs=in_specs,
        out_specs=pl.BlockSpec((1, 1, 10), lambda b: (b, 0, 0)),
        compiler_params=pltpu.CompilerParams(
            dimension_semantics=("parallel",),
            vmem_limit_bytes=32 * 1024 * 1024,
        ),
    )(x, *weights)
    return out.reshape(N, 10)


# ---------------------------------------------------------------------------
# Deterministic parameter init (PyTorch CNNModel layout) + one-time re-layout
# ---------------------------------------------------------------------------
def init_params(key):
    ks = jax.random.split(key, 10)

    def u(k, shape, fan_in):
        bound = 1.0 / jnp.sqrt(float(fan_in))
        return jax.random.uniform(k, shape, jnp.float32, -bound, bound)

    return {
        "conv1_w": u(ks[0], (6, 1, 5, 5), 1 * 5 * 5),
        "conv1_b": u(ks[1], (6,), 1 * 5 * 5),
        "conv2_w": u(ks[2], (16, 6, 5, 5), 6 * 5 * 5),
        "conv2_b": u(ks[3], (16,), 6 * 5 * 5),
        "fc1_w": u(ks[4], (120, 256), 256),
        "fc1_b": u(ks[5], (120,), 256),
        "fc2_w": u(ks[6], (84, 120), 120),
        "fc2_b": u(ks[7], (84,), 120),
        "fc3_w": u(ks[8], (10, 84), 84),
        "fc3_b": u(ks[9], (10,), 84),
    }


def prepare_params(p):
    """One-time re-layout of the PyTorch weights into kernel-ready tensors."""
    f32 = jnp.float32
    j5 = np.arange(5)[:, None, None]

    # conv1 banded weights: w1b[i, win, c*24+ow] = conv1_w[c,0,i,win-ow] if 0<=win-ow<=4
    B1 = (np.arange(28)[None, :, None] == np.arange(24)[None, None, :] + j5).astype(np.float32)
    w1b = jnp.einsum("cij,jwo->iwco", p["conv1_w"][:, 0].astype(f32), jnp.asarray(B1))
    w1b = w1b.reshape(5, 28, 6 * 24)                       # (5, 28, 144)
    b1w = jnp.repeat(p["conv1_b"].astype(f32), 24).reshape(1, 144)

    # conv2 banded weights: w2b[ci*5+i, win, co*8+ow] = conv2_w[co,ci,i,win-ow] (banded)
    B2 = (np.arange(12)[None, :, None] == np.arange(8)[None, None, :] + j5).astype(np.float32)
    w2b = jnp.einsum("abij,jwo->biwao", p["conv2_w"].astype(f32), jnp.asarray(B2))
    w2b = w2b.reshape(30, 12, 16 * 8)                      # (30, 12, 128)
    b2w = jnp.repeat(p["conv2_b"].astype(f32), 8).reshape(1, 128)

    # fc1: fold the (C,H,W) flatten: w1r[ph, co*4+pw, o] = fc1_w[o, co*16+ph*4+pw]
    w1r = (p["fc1_w"].astype(f32).reshape(120, 16, 4, 4)
           .transpose(2, 1, 3, 0).reshape(4, 64, 120))
    b1f = p["fc1_b"].astype(f32).reshape(1, 120)
    w2f = p["fc2_w"].astype(f32).T                         # (120, 84)
    b2f = p["fc2_b"].astype(f32).reshape(1, 84)
    w3f = p["fc3_w"].astype(f32).T                         # (84, 10)
    b3f = p["fc3_b"].astype(f32).reshape(1, 10)

    return dict(w1b=w1b, b1w=b1w, w2b=w2b, b2w=b2w, w1r=w1r, b1f=b1f,
                w2f=w2f, b2f=b2f, w3f=w3f, b3f=b3f)


# ---------------------------------------------------------------------------
# Plain-XLA reference of CNNModel.forward (for correctness cross-check)
# ---------------------------------------------------------------------------
def reference_forward(params, x):
    dn = ("NCHW", "OIHW", "NCHW")
    y = lax.conv_general_dilated(x, params["conv1_w"], (1, 1), "VALID",
                                 dimension_numbers=dn)
    y = jax.nn.relu(y + params["conv1_b"].reshape(1, -1, 1, 1))
    y = lax.reduce_window(y, -jnp.inf, lax.max, (1, 1, 2, 2), (1, 1, 2, 2), "VALID")
    y = lax.conv_general_dilated(y, params["conv2_w"], (1, 1), "VALID",
                                 dimension_numbers=dn)
    y = jax.nn.relu(y + params["conv2_b"].reshape(1, -1, 1, 1))
    y = lax.reduce_window(y, -jnp.inf, lax.max, (1, 1, 2, 2), (1, 1, 2, 2), "VALID")
    y = y.reshape(y.shape[0], -1)                          # (N, 256), (C,H,W) order
    y = jax.nn.relu(y @ params["fc1_w"].T + params["fc1_b"])
    y = jax.nn.relu(y @ params["fc2_w"].T + params["fc2_b"])
    y = y @ params["fc3_w"].T + params["fc3_b"]
    return jax.nn.log_softmax(y, axis=-1)


if __name__ == "__main__":
    key = jax.random.PRNGKey(0)
    pkey, xkey = jax.random.split(key)
    params = init_params(pkey)
    kparams = prepare_params(params)

    # LeNet geometry requires 28x28 single-channel input so fc1 sees 16*4*4 = 256.
    x = jax.random.normal(xkey, (2, 1, 28, 28), jnp.float32)

    out = lenet_forward(kparams, x)
    jax.block_until_ready(out)

    assert out.shape == (2, 10)
    assert bool(jnp.all(jnp.isfinite(out)))
    # log_softmax rows must sum to ~1 in probability space
    assert bool(jnp.allclose(jnp.sum(jnp.exp(out), axis=-1), 1.0, atol=1e-4))

    # cross-check the fused kernel against a plain-XLA reference of the same model
    with jax.default_matmul_precision("float32"):
        ref = reference_forward(params, x)
    max_err = float(jnp.max(jnp.abs(out - ref)))
    assert bool(jnp.allclose(out, ref, atol=2e-2, rtol=2e-2)), max_err

    print("KERNEL_OK")
</pallas_src>

<mosaic_0001>
module attributes {stable_mosaic.version = 11 : i64} {
  func.func @_lenet_kernel(%arg0: i32, %arg1: memref<1x1x28x28xf32, #tpu.memory_space<vmem>>, %arg2: memref<5x28x144xf32, #tpu.memory_space<vmem>>, %arg3: memref<1x144xf32, #tpu.memory_space<vmem>>, %arg4: memref<30x12x128xf32, #tpu.memory_space<vmem>>, %arg5: memref<1x128xf32, #tpu.memory_space<vmem>>, %arg6: memref<4x64x120xf32, #tpu.memory_space<vmem>>, %arg7: memref<1x120xf32, #tpu.memory_space<vmem>>, %arg8: memref<120x84xf32, #tpu.memory_space<vmem>>, %arg9: memref<1x84xf32, #tpu.memory_space<vmem>>, %arg10: memref<84x10xf32, #tpu.memory_space<vmem>>, %arg11: memref<1x10xf32, #tpu.memory_space<vmem>>, %arg12: memref<1x1x10xf32, #tpu.memory_space<vmem>>) attributes {dimension_semantics = [#tpu.dimension_semantics<parallel>], iteration_bounds = array<i64: 2>, scalar_prefetch = 0 : i64, scratch_operands = 0 : i64, tpu.core_type = #tpu.core_type<tc>, window_params = [{transform_indices = @transform_0, window_bounds = array<i64: 1, 1, 28, 28>}, {pipeline_mode = #tpu.pipeline_mode<synchronous>, transform_indices = @transform_1, window_bounds = array<i64: 5, 28, 144>}, {pipeline_mode = #tpu.pipeline_mode<synchronous>, transform_indices = @transform_2, window_bounds = array<i64: 1, 144>}, {pipeline_mode = #tpu.pipeline_mode<synchronous>, transform_indices = @transform_3, window_bounds = array<i64: 30, 12, 128>}, {pipeline_mode = #tpu.pipeline_mode<synchronous>, transform_indices = @transform_4, window_bounds = array<i64: 1, 128>}, {pipeline_mode = #tpu.pipeline_mode<synchronous>, transform_indices = @transform_5, window_bounds = array<i64: 4, 64, 120>}, {pipeline_mode = #tpu.pipeline_mode<synchronous>, transform_indices = @transform_6, window_bounds = array<i64: 1, 120>}, {pipeline_mode = #tpu.pipeline_mode<synchronous>, transform_indices = @transform_7, window_bounds = array<i64: 120, 84>}, {pipeline_mode = #tpu.pipeline_mode<synchronous>, transform_indices = @transform_8, window_bounds = array<i64: 1, 84>}, {pipeline_mode = #tpu.pipeline_mode<synchronous>, transform_indices = @transform_9, window_bounds = array<i64: 84, 10>}, {pipeline_mode = #tpu.pipeline_mode<synchronous>, transform_indices = @transform_10, window_bounds = array<i64: 1, 10>}, {transform_indices = @transform_11, window_bounds = array<i64: 1, 1, 10>}]} {
    %c0 = arith.constant 0 : index
    %c0_0 = arith.constant 0 : index
    %c0_1 = arith.constant 0 : index
    %c0_2 = arith.constant 0 : index
    %0 = vector.load %arg1[%c0, %c0_0, %c0_1, %c0_2] : memref<1x1x28x28xf32, #tpu.memory_space<vmem>>, vector<1x1x28x28xf32>
    %1 = vector.shape_cast %0 : vector<1x1x28x28xf32> to vector<28x28xf32>
    %2 = vector.extract_strided_slice %1 {offsets = [0, 0], sizes = [24, 28], strides = [1, 1]} : vector<28x28xf32> to vector<24x28xf32>
    %c0_3 = arith.constant 0 : index
    %c0_4 = arith.constant 0 : index
    %c0_5 = arith.constant 0 : index
    %3 = vector.load %arg2[%c0_3, %c0_4, %c0_5] : memref<5x28x144xf32, #tpu.memory_space<vmem>>, vector<1x28x144xf32>
    %4 = vector.shape_cast %3 : vector<1x28x144xf32> to vector<28x144xf32>
    %cst = arith.constant dense<0.000000e+00> : vector<24x144xf32>
    %5 = tpu.matmul %2, %4, %cst {dimension_numbers = #tpu.dot_dimension_numbers<[1], [0], [0], [1], [0, 0, 1, 1], [], []>} : vector<24x28xf32>, vector<28x144xf32>, vector<24x144xf32> -> vector<24x144xf32>
    %6 = vector.extract_strided_slice %1 {offsets = [1, 0], sizes = [24, 28], strides = [1, 1]} : vector<28x28xf32> to vector<24x28xf32>
    %c1 = arith.constant 1 : index
    %c0_6 = arith.constant 0 : index
    %c0_7 = arith.constant 0 : index
    %7 = vector.load %arg2[%c1, %c0_6, %c0_7] : memref<5x28x144xf32, #tpu.memory_space<vmem>>, vector<1x28x144xf32>
    %8 = vector.shape_cast %7 : vector<1x28x144xf32> to vector<28x144xf32>
    %cst_8 = arith.constant dense<0.000000e+00> : vector<24x144xf32>
    %9 = tpu.matmul %6, %8, %cst_8 {dimension_numbers = #tpu.dot_dimension_numbers<[1], [0], [0], [1], [0, 0, 1, 1], [], []>} : vector<24x28xf32>, vector<28x144xf32>, vector<24x144xf32> -> vector<24x144xf32>
    %10 = arith.addf %5, %9 : vector<24x144xf32>
    %11 = vector.extract_strided_slice %1 {offsets = [2, 0], sizes = [24, 28], strides = [1, 1]} : vector<28x28xf32> to vector<24x28xf32>
    %c2 = arith.constant 2 : index
    %c0_9 = arith.constant 0 : index
    %c0_10 = arith.constant 0 : index
    %12 = vector.load %arg2[%c2, %c0_9, %c0_10] : memref<5x28x144xf32, #tpu.memory_space<vmem>>, vector<1x28x144xf32>
    %13 = vector.shape_cast %12 : vector<1x28x144xf32> to vector<28x144xf32>
    %cst_11 = arith.constant dense<0.000000e+00> : vector<24x144xf32>
    %14 = tpu.matmul %11, %13, %cst_11 {dimension_numbers = #tpu.dot_dimension_numbers<[1], [0], [0], [1], [0, 0, 1, 1], [], []>} : vector<24x28xf32>, vector<28x144xf32>, vector<24x144xf32> -> vector<24x144xf32>
    %15 = arith.addf %10, %14 : vector<24x144xf32>
    %16 = vector.extract_strided_slice %1 {offsets = [3, 0], sizes = [24, 28], strides = [1, 1]} : vector<28x28xf32> to vector<24x28xf32>
    %c3 = arith.constant 3 : index
    %c0_12 = arith.constant 0 : index
    %c0_13 = arith.constant 0 : index
    %17 = vector.load %arg2[%c3, %c0_12, %c0_13] : memref<5x28x144xf32, #tpu.memory_space<vmem>>, vector<1x28x144xf32>
    %18 = vector.shape_cast %17 : vector<1x28x144xf32> to vector<28x144xf32>
    %cst_14 = arith.constant dense<0.000000e+00> : vector<24x144xf32>
    %19 = tpu.matmul %16, %18, %cst_14 {dimension_numbers = #tpu.dot_dimension_numbers<[1], [0], [0], [1], [0, 0, 1, 1], [], []>} : vector<24x28xf32>, vector<28x144xf32>, vector<24x144xf32> -> vector<24x144xf32>
    %20 = arith.addf %15, %19 : vector<24x144xf32>
    %21 = vector.extract_strided_slice %1 {offsets = [4, 0], sizes = [24, 28], strides = [1, 1]} : vector<28x28xf32> to vector<24x28xf32>
    %c4 = arith.constant 4 : index
    %c0_15 = arith.constant 0 : index
    %c0_16 = arith.constant 0 : index
    %22 = vector.load %arg2[%c4, %c0_15, %c0_16] : memref<5x28x144xf32, #tpu.memory_space<vmem>>, vector<1x28x144xf32>
    %23 = vector.shape_cast %22 : vector<1x28x144xf32> to vector<28x144xf32>
    %cst_17 = arith.constant dense<0.000000e+00> : vector<24x144xf32>
    %24 = tpu.matmul %21, %23, %cst_17 {dimension_numbers = #tpu.dot_dimension_numbers<[1], [0], [0], [1], [0, 0, 1, 1], [], []>} : vector<24x28xf32>, vector<28x144xf32>, vector<24x144xf32> -> vector<24x144xf32>
    %25 = arith.addf %20, %24 : vector<24x144xf32>
    %c0_18 = arith.constant 0 : index
    %c0_19 = arith.constant 0 : index
    %26 = vector.load %arg3[%c0_18, %c0_19] : memref<1x144xf32, #tpu.memory_space<vmem>>, vector<1x144xf32>
    %27 = vector.broadcast %26 : vector<1x144xf32> to vector<24x144xf32>
    %28 = arith.addf %25, %27 : vector<24x144xf32>
    %cst_20 = arith.constant 0.000000e+00 : f32
    %29 = vector.broadcast %cst_20 : f32 to vector<24x144xf32>
    %30 = arith.maximumf %28, %29 : vector<24x144xf32>
    %31 = vector.extract_strided_slice %30 {offsets = [0, 0], sizes = [24, 143], strides = [1, 1]} : vector<24x144xf32> to vector<24x143xf32>
    %32 = vector.extract_strided_slice %30 {offsets = [0, 1], sizes = [24, 143], strides = [1, 1]} : vector<24x144xf32> to vector<24x143xf32>
    %33 = arith.maximumf %31, %32 : vector<24x143xf32>
    %34 = vector.extract_strided_slice %33 {offsets = [0, 0], sizes = [23, 143], strides = [1, 1]} : vector<24x143xf32> to vector<23x143xf32>
    %35 = vector.extract_strided_slice %33 {offsets = [1, 0], sizes = [23, 143], strides = [1, 1]} : vector<24x143xf32> to vector<23x143xf32>
    %36 = arith.maximumf %34, %35 : vector<23x143xf32>
    %37 = tpu.iota {dimensions = array<i32: 0>} : vector<12x23xi32>
    %38 = tpu.iota {dimensions = array<i32: 1>} : vector<12x23xi32>
    %c2_i32 = arith.constant 2 : i32
    %39 = vector.broadcast %c2_i32 : i32 to vector<12x23xi32>
    %40 = arith.muli %39, %37 : vector<12x23xi32>
    %41 = arith.cmpi eq, %38, %40 : vector<12x23xi32>
    %42 = arith.extui %41 : vector<12x23xi1> to vector<12x23xi32>
    %43 = arith.sitofp %42 : vector<12x23xi32> to vector<12x23xf32>
    %44 = tpu.iota {dimensions = array<i32: 0>} : vector<143x72xi32>
    %45 = tpu.iota {dimensions = array<i32: 1>} : vector<143x72xi32>
    %c2_i32_21 = arith.constant 2 : i32
    %46 = vector.broadcast %c2_i32_21 : i32 to vector<143x72xi32>
    %47 = arith.muli %46, %45 : vector<143x72xi32>
    %48 = arith.cmpi eq, %44, %47 : vector<143x72xi32>
    %49 = arith.extui %48 : vector<143x72xi1> to vector<143x72xi32>
    %50 = arith.sitofp %49 : vector<143x72xi32> to vector<143x72xf32>
    %cst_22 = arith.constant dense<0.000000e+00> : vector<12x143xf32>
    %51 = tpu.matmul %43, %36, %cst_22 {dimension_numbers = #tpu.dot_dimension_numbers<[1], [0], [0], [1], [0, 0, 1, 1], [], []>} : vector<12x23xf32>, vector<23x143xf32>, vector<12x143xf32> -> vector<12x143xf32>
    %cst_23 = arith.constant dense<0.000000e+00> : vector<12x72xf32>
    %52 = tpu.matmul %51, %50, %cst_23 {dimension_numbers = #tpu.dot_dimension_numbers<[1], [0], [0], [1], [0, 0, 1, 1], [], []>} : vector<12x143xf32>, vector<143x72xf32>, vector<12x72xf32> -> vector<12x72xf32>
    %53 = vector.extract_strided_slice %52 {offsets = [0, 0], sizes = [12, 12], strides = [1, 1]} : vector<12x72xf32> to vector<12x12xf32>
    %54 = vector.extract_strided_slice %53 {offsets = [0, 0], sizes = [8, 12], strides = [1, 1]} : vector<12x12xf32> to vector<8x12xf32>
    %c0_24 = arith.constant 0 : index
    %c0_25 = arith.constant 0 : index
    %c0_26 = arith.constant 0 : index
    %55 = vector.load %arg4[%c0_24, %c0_25, %c0_26] : memref<30x12x128xf32, #tpu.memory_space<vmem>>, vector<1x12x128xf32>
    %56 = vector.shape_cast %55 : vector<1x12x128xf32> to vector<12x128xf32>
    %cst_27 = arith.constant dense<0.000000e+00> : vector<8x128xf32>
    %57 = tpu.matmul %54, %56, %cst_27 {dimension_numbers = #tpu.dot_dimension_numbers<[1], [0], [0], [1], [0, 0, 1, 1], [], []>} : vector<8x12xf32>, vector<12x128xf32>, vector<8x128xf32> -> vector<8x128xf32>
    %58 = vector.extract_strided_slice %53 {offsets = [1, 0], sizes = [8, 12], strides = [1, 1]} : vector<12x12xf32> to vector<8x12xf32>
    %c1_28 = arith.constant 1 : index
    %c0_29 = arith.constant 0 : index
    %c0_30 = arith.constant 0 : index
    %59 = vector.load %arg4[%c1_28, %c0_29, %c0_30] : memref<30x12x128xf32, #tpu.memory_space<vmem>>, vector<1x12x128xf32>
    %60 = vector.shape_cast %59 : vector<1x12x128xf32> to vector<12x128xf32>
    %cst_31 = arith.constant dense<0.000000e+00> : vector<8x128xf32>
    %61 = tpu.matmul %58, %60, %cst_31 {dimension_numbers = #tpu.dot_dimension_numbers<[1], [0], [0], [1], [0, 0, 1, 1], [], []>} : vector<8x12xf32>, vector<12x128xf32>, vector<8x128xf32> -> vector<8x128xf32>
    %62 = arith.addf %57, %61 : vector<8x128xf32>
    %63 = vector.extract_strided_slice %53 {offsets = [2, 0], sizes = [8, 12], strides = [1, 1]} : vector<12x12xf32> to vector<8x12xf32>
    %c2_32 = arith.constant 2 : index
    %c0_33 = arith.constant 0 : index
    %c0_34 = arith.constant 0 : index
    %64 = vector.load %arg4[%c2_32, %c0_33, %c0_34] : memref<30x12x128xf32, #tpu.memory_space<vmem>>, vector<1x12x128xf32>
    %65 = vector.shape_cast %64 : vector<1x12x128xf32> to vector<12x128xf32>
    %cst_35 = arith.constant dense<0.000000e+00> : vector<8x128xf32>
    %66 = tpu.matmul %63, %65, %cst_35 {dimension_numbers = #tpu.dot_dimension_numbers<[1], [0], [0], [1], [0, 0, 1, 1], [], []>} : vector<8x12xf32>, vector<12x128xf32>, vector<8x128xf32> -> vector<8x128xf32>
    %67 = arith.addf %62, %66 : vector<8x128xf32>
    %68 = vector.extract_strided_slice %53 {offsets = [3, 0], sizes = [8, 12], strides = [1, 1]} : vector<12x12xf32> to vector<8x12xf32>
    %c3_36 = arith.constant 3 : index
    %c0_37 = arith.constant 0 : index
    %c0_38 = arith.constant 0 : index
    %69 = vector.load %arg4[%c3_36, %c0_37, %c0_38] : memref<30x12x128xf32, #tpu.memory_space<vmem>>, vector<1x12x128xf32>
    %70 = vector.shape_cast %69 : vector<1x12x128xf32> to vector<12x128xf32>
    %cst_39 = arith.constant dense<0.000000e+00> : vector<8x128xf32>
    %71 = tpu.matmul %68, %70, %cst_39 {dimension_numbers = #tpu.dot_dimension_numbers<[1], [0], [0], [1], [0, 0, 1, 1], [], []>} : vector<8x12xf32>, vector<12x128xf32>, vector<8x128xf32> -> vector<8x128xf32>
    %72 = arith.addf %67, %71 : vector<8x128xf32>
    %73 = vector.extract_strided_slice %53 {offsets = [4, 0], sizes = [8, 12], strides = [1, 1]} : vector<12x12xf32> to vector<8x12xf32>
    %c4_40 = arith.constant 4 : index
    %c0_41 = arith.constant 0 : index
    %c0_42 = arith.constant 0 : index
    %74 = vector.load %arg4[%c4_40, %c0_41, %c0_42] : memref<30x12x128xf32, #tpu.memory_space<vmem>>, vector<1x12x128xf32>
    %75 = vector.shape_cast %74 : vector<1x12x128xf32> to vector<12x128xf32>
    %cst_43 = arith.constant dense<0.000000e+00> : vector<8x128xf32>
    %76 = tpu.matmul %73, %75, %cst_43 {dimension_numbers = #tpu.dot_dimension_numbers<[1], [0], [0], [1], [0, 0, 1, 1], [], []>} : vector<8x12xf32>, vector<12x128xf32>, vector<8x128xf32> -> vector<8x128xf32>
    %77 = arith.addf %72, %76 : vector<8x128xf32>
    %78 = vector.extract_strided_slice %52 {offsets = [0, 12], sizes = [12, 12], strides = [1, 1]} : vector<12x72xf32> to vector<12x12xf32>
    %79 = vector.extract_strided_slice %78 {offsets = [0, 0], sizes = [8, 12], strides = [1, 1]} : vector<12x12xf32> to vector<8x12xf32>
    %c5 = arith.constant 5 : index
    %c0_44 = arith.constant 0 : index
    %c0_45 = arith.constant 0 : index
    %80 = vector.load %arg4[%c5, %c0_44, %c0_45] : memref<30x12x128xf32, #tpu.memory_space<vmem>>, vector<1x12x128xf32>
    %81 = vector.shape_cast %80 : vector<1x12x128xf32> to vector<12x128xf32>
    %cst_46 = arith.constant dense<0.000000e+00> : vector<8x128xf32>
    %82 = tpu.matmul %79, %81, %cst_46 {dimension_numbers = #tpu.dot_dimension_numbers<[1], [0], [0], [1], [0, 0, 1, 1], [], []>} : vector<8x12xf32>, vector<12x128xf32>, vector<8x128xf32> -> vector<8x128xf32>
    %83 = arith.addf %77, %82 : vector<8x128xf32>
    %84 = vector.extract_strided_slice %78 {offsets = [1, 0], sizes = [8, 12], strides = [1, 1]} : vector<12x12xf32> to vector<8x12xf32>
    %c6 = arith.constant 6 : index
    %c0_47 = arith.constant 0 : index
    %c0_48 = arith.constant 0 : index
    %85 = vector.load %arg4[%c6, %c0_47, %c0_48] : memref<30x12x128xf32, #tpu.memory_space<vmem>>, vector<1x12x128xf32>
    %86 = vector.shape_cast %85 : vector<1x12x128xf32> to vector<12x128xf32>
    %cst_49 = arith.constant dense<0.000000e+00> : vector<8x128xf32>
    %87 = tpu.matmul %84, %86, %cst_49 {dimension_numbers = #tpu.dot_dimension_numbers<[1], [0], [0], [1], [0, 0, 1, 1], [], []>} : vector<8x12xf32>, vector<12x128xf32>, vector<8x128xf32> -> vector<8x128xf32>
    %88 = arith.addf %83, %87 : vector<8x128xf32>
    %89 = vector.extract_strided_slice %78 {offsets = [2, 0], sizes = [8, 12], strides = [1, 1]} : vector<12x12xf32> to vector<8x12xf32>
    %c7 = arith.constant 7 : index
    %c0_50 = arith.constant 0 : index
    %c0_51 = arith.constant 0 : index
    %90 = vector.load %arg4[%c7, %c0_50, %c0_51] : memref<30x12x128xf32, #tpu.memory_space<vmem>>, vector<1x12x128xf32>
    %91 = vector.shape_cast %90 : vector<1x12x128xf32> to vector<12x128xf32>
    %cst_52 = arith.constant dense<0.000000e+00> : vector<8x128xf32>
    %92 = tpu.matmul %89, %91, %cst_52 {dimension_numbers = #tpu.dot_dimension_numbers<[1], [0], [0], [1], [0, 0, 1, 1], [], []>} : vector<8x12xf32>, vector<12x128xf32>, vector<8x128xf32> -> vector<8x128xf32>
    %93 = arith.addf %88, %92 : vector<8x128xf32>
    %94 = vector.extract_strided_slice %78 {offsets = [3, 0], sizes = [8, 12], strides = [1, 1]} : vector<12x12xf32> to vector<8x12xf32>
    %c8 = arith.constant 8 : index
    %c0_53 = arith.constant 0 : index
    %c0_54 = arith.constant 0 : index
    %95 = vector.load %arg4[%c8, %c0_53, %c0_54] : memref<30x12x128xf32, #tpu.memory_space<vmem>>, vector<1x12x128xf32>
    %96 = vector.shape_cast %95 : vector<1x12x128xf32> to vector<12x128xf32>
    %cst_55 = arith.constant dense<0.000000e+00> : vector<8x128xf32>
    %97 = tpu.matmul %94, %96, %cst_55 {dimension_numbers = #tpu.dot_dimension_numbers<[1], [0], [0], [1], [0, 0, 1, 1], [], []>} : vector<8x12xf32>, vector<12x128xf32>, vector<8x128xf32> -> vector<8x128xf32>
    %98 = arith.addf %93, %97 : vector<8x128xf32>
    %99 = vector.extract_strided_slice %78 {offsets = [4, 0], sizes = [8, 12], strides = [1, 1]} : vector<12x12xf32> to vector<8x12xf32>
    %c9 = arith.constant 9 : index
    %c0_56 = arith.constant 0 : index
    %c0_57 = arith.constant 0 : index
    %100 = vector.load %arg4[%c9, %c0_56, %c0_57] : memref<30x12x128xf32, #tpu.memory_space<vmem>>, vector<1x12x128xf32>
    %101 = vector.shape_cast %100 : vector<1x12x128xf32> to vector<12x128xf32>
    %cst_58 = arith.constant dense<0.000000e+00> : vector<8x128xf32>
    %102 = tpu.matmul %99, %101, %cst_58 {dimension_numbers = #tpu.dot_dimension_numbers<[1], [0], [0], [1], [0, 0, 1, 1], [], []>} : vector<8x12xf32>, vector<12x128xf32>, vector<8x128xf32> -> vector<8x128xf32>
    %103 = arith.addf %98, %102 : vector<8x128xf32>
    %104 = vector.extract_strided_slice %52 {offsets = [0, 24], sizes = [12, 12], strides = [1, 1]} : vector<12x72xf32> to vector<12x12xf32>
    %105 = vector.extract_strided_slice %104 {offsets = [0, 0], sizes = [8, 12], strides = [1, 1]} : vector<12x12xf32> to vector<8x12xf32>
    %c10 = arith.constant 10 : index
    %c0_59 = arith.constant 0 : index
    %c0_60 = arith.constant 0 : index
    %106 = vector.load %arg4[%c10, %c0_59, %c0_60] : memref<30x12x128xf32, #tpu.memory_space<vmem>>, vector<1x12x128xf32>
    %107 = vector.shape_cast %106 : vector<1x12x128xf32> to vector<12x128xf32>
    %cst_61 = arith.constant dense<0.000000e+00> : vector<8x128xf32>
    %108 = tpu.matmul %105, %107, %cst_61 {dimension_numbers = #tpu.dot_dimension_numbers<[1], [0], [0], [1], [0, 0, 1, 1], [], []>} : vector<8x12xf32>, vector<12x128xf32>, vector<8x128xf32> -> vector<8x128xf32>
    %109 = arith.addf %103, %108 : vector<8x128xf32>
    %110 = vector.extract_strided_slice %104 {offsets = [1, 0], sizes = [8, 12], strides = [1, 1]} : vector<12x12xf32> to vector<8x12xf32>
    %c11 = arith.constant 11 : index
    %c0_62 = arith.constant 0 : index
    %c0_63 = arith.constant 0 : index
    %111 = vector.load %arg4[%c11, %c0_62, %c0_63] : memref<30x12x128xf32, #tpu.memory_space<vmem>>, vector<1x12x128xf32>
    %112 = vector.shape_cast %111 : vector<1x12x128xf32> to vector<12x128xf32>
    %cst_64 = arith.constant dense<0.000000e+00> : vector<8x128xf32>
    %113 = tpu.matmul %110, %112, %cst_64 {dimension_numbers = #tpu.dot_dimension_numbers<[1], [0], [0], [1], [0, 0, 1, 1], [], []>} : vector<8x12xf32>, vector<12x128xf32>, vector<8x128xf32> -> vector<8x128xf32>
    %114 = arith.addf %109, %113 : vector<8x128xf32>
    %115 = vector.extract_strided_slice %104 {offsets = [2, 0], sizes = [8, 12], strides = [1, 1]} : vector<12x12xf32> to vector<8x12xf32>
    %c12 = arith.constant 12 : index
    %c0_65 = arith.constant 0 : index
    %c0_66 = arith.constant 0 : index
    %116 = vector.load %arg4[%c12, %c0_65, %c0_66] : memref<30x12x128xf32, #tpu.memory_space<vmem>>, vector<1x12x128xf32>
    %117 = vector.shape_cast %116 : vector<1x12x128xf32> to vector<12x128xf32>
    %cst_67 = arith.constant dense<0.000000e+00> : vector<8x128xf32>
    %118 = tpu.matmul %115, %117, %cst_67 {dimension_numbers = #tpu.dot_dimension_numbers<[1], [0], [0], [1], [0, 0, 1, 1], [], []>} : vector<8x12xf32>, vector<12x128xf32>, vector<8x128xf32> -> vector<8x128xf32>
    %119 = arith.addf %114, %118 : vector<8x128xf32>
    %120 = vector.extract_strided_slice %104 {offsets = [3, 0], sizes = [8, 12], strides = [1, 1]} : vector<12x12xf32> to vector<8x12xf32>
    %c13 = arith.constant 13 : index
    %c0_68 = arith.constant 0 : index
    %c0_69 = arith.constant 0 : index
    %121 = vector.load %arg4[%c13, %c0_68, %c0_69] : memref<30x12x128xf32, #tpu.memory_space<vmem>>, vector<1x12x128xf32>
    %122 = vector.shape_cast %121 : vector<1x12x128xf32> to vector<12x128xf32>
    %cst_70 = arith.constant dense<0.000000e+00> : vector<8x128xf32>
    %123 = tpu.matmul %120, %122, %cst_70 {dimension_numbers = #tpu.dot_dimension_numbers<[1], [0], [0], [1], [0, 0, 1, 1], [], []>} : vector<8x12xf32>, vector<12x128xf32>, vector<8x128xf32> -> vector<8x128xf32>
    %124 = arith.addf %119, %123 : vector<8x128xf32>
    %125 = vector.extract_strided_slice %104 {offsets = [4, 0], sizes = [8, 12], strides = [1, 1]} : vector<12x12xf32> to vector<8x12xf32>
    %c14 = arith.constant 14 : index
    %c0_71 = arith.constant 0 : index
    %c0_72 = arith.constant 0 : index
    %126 = vector.load %arg4[%c14, %c0_71, %c0_72] : memref<30x12x128xf32, #tpu.memory_space<vmem>>, vector<1x12x128xf32>
    %127 = vector.shape_cast %126 : vector<1x12x128xf32> to vector<12x128xf32>
    %cst_73 = arith.constant dense<0.000000e+00> : vector<8x128xf32>
    %128 = tpu.matmul %125, %127, %cst_73 {dimension_numbers = #tpu.dot_dimension_numbers<[1], [0], [0], [1], [0, 0, 1, 1], [], []>} : vector<8x12xf32>, vector<12x128xf32>, vector<8x128xf32> -> vector<8x128xf32>
    %129 = arith.addf %124, %128 : vector<8x128xf32>
    %130 = vector.extract_strided_slice %52 {offsets = [0, 36], sizes = [12, 12], strides = [1, 1]} : vector<12x72xf32> to vector<12x12xf32>
    %131 = vector.extract_strided_slice %130 {offsets = [0, 0], sizes = [8, 12], strides = [1, 1]} : vector<12x12xf32> to vector<8x12xf32>
    %c15 = arith.constant 15 : index
    %c0_74 = arith.constant 0 : index
    %c0_75 = arith.constant 0 : index
    %132 = vector.load %arg4[%c15, %c0_74, %c0_75] : memref<30x12x128xf32, #tpu.memory_space<vmem>>, vector<1x12x128xf32>
    %133 = vector.shape_cast %132 : vector<1x12x128xf32> to vector<12x128xf32>
    %cst_76 = arith.constant dense<0.000000e+00> : vector<8x128xf32>
    %134 = tpu.matmul %131, %133, %cst_76 {dimension_numbers = #tpu.dot_dimension_numbers<[1], [0], [0], [1], [0, 0, 1, 1], [], []>} : vector<8x12xf32>, vector<12x128xf32>, vector<8x128xf32> -> vector<8x128xf32>
    %135 = arith.addf %129, %134 : vector<8x128xf32>
    %136 = vector.extract_strided_slice %130 {offsets = [1, 0], sizes = [8, 12], strides = [1, 1]} : vector<12x12xf32> to vector<8x12xf32>
    %c16 = arith.constant 16 : index
    %c0_77 = arith.constant 0 : index
    %c0_78 = arith.constant 0 : index
    %137 = vector.load %arg4[%c16, %c0_77, %c0_78] : memref<30x12x128xf32, #tpu.memory_space<vmem>>, vector<1x12x128xf32>
    %138 = vector.shape_cast %137 : vector<1x12x128xf32> to vector<12x128xf32>
    %cst_79 = arith.constant dense<0.000000e+00> : vector<8x128xf32>
    %139 = tpu.matmul %136, %138, %cst_79 {dimension_numbers = #tpu.dot_dimension_numbers<[1], [0], [0], [1], [0, 0, 1, 1], [], []>} : vector<8x12xf32>, vector<12x128xf32>, vector<8x128xf32> -> vector<8x128xf32>
    %140 = arith.addf %135, %139 : vector<8x128xf32>
    %141 = vector.extract_strided_slice %130 {offsets = [2, 0], sizes = [8, 12], strides = [1, 1]} : vector<12x12xf32> to vector<8x12xf32>
    %c17 = arith.constant 17 : index
    %c0_80 = arith.constant 0 : index
    %c0_81 = arith.constant 0 : index
    %142 = vector.load %arg4[%c17, %c0_80, %c0_81] : memref<30x12x128xf32, #tpu.memory_space<vmem>>, vector<1x12x128xf32>
    %143 = vector.shape_cast %142 : vector<1x12x128xf32> to vector<12x128xf32>
    %cst_82 = arith.constant dense<0.000000e+00> : vector<8x128xf32>
    %144 = tpu.matmul %141, %143, %cst_82 {dimension_numbers = #tpu.dot_dimension_numbers<[1], [0], [0], [1], [0, 0, 1, 1], [], []>} : vector<8x12xf32>, vector<12x128xf32>, vector<8x128xf32> -> vector<8x128xf32>
    %145 = arith.addf %140, %144 : vector<8x128xf32>
    %146 = vector.extract_strided_slice %130 {offsets = [3, 0], sizes = [8, 12], strides = [1, 1]} : vector<12x12xf32> to vector<8x12xf32>
    %c18 = arith.constant 18 : index
    %c0_83 = arith.constant 0 : index
    %c0_84 = arith.constant 0 : index
    %147 = vector.load %arg4[%c18, %c0_83, %c0_84] : memref<30x12x128xf32, #tpu.memory_space<vmem>>, vector<1x12x128xf32>
    %148 = vector.shape_cast %147 : vector<1x12x128xf32> to vector<12x128xf32>
    %cst_85 = arith.constant dense<0.000000e+00> : vector<8x128xf32>
    %149 = tpu.matmul %146, %148, %cst_85 {dimension_numbers = #tpu.dot_dimension_numbers<[1], [0], [0], [1], [0, 0, 1, 1], [], []>} : vector<8x12xf32>, vector<12x128xf32>, vector<8x128xf32> -> vector<8x128xf32>
    %150 = arith.addf %145, %149 : vector<8x128xf32>
    %151 = vector.extract_strided_slice %130 {offsets = [4, 0], sizes = [8, 12], strides = [1, 1]} : vector<12x12xf32> to vector<8x12xf32>
    %c19 = arith.constant 19 : index
    %c0_86 = arith.constant 0 : index
    %c0_87 = arith.constant 0 : index
    %152 = vector.load %arg4[%c19, %c0_86, %c0_87] : memref<30x12x128xf32, #tpu.memory_space<vmem>>, vector<1x12x128xf32>
    %153 = vector.shape_cast %152 : vector<1x12x128xf32> to vector<12x128xf32>
    %cst_88 = arith.constant dense<0.000000e+00> : vector<8x128xf32>
    %154 = tpu.matmul %151, %153, %cst_88 {dimension_numbers = #tpu.dot_dimension_numbers<[1], [0], [0], [1], [0, 0, 1, 1], [], []>} : vector<8x12xf32>, vector<12x128xf32>, vector<8x128xf32> -> vector<8x128xf32>
    %155 = arith.addf %150, %154 : vector<8x128xf32>
    %156 = vector.extract_strided_slice %52 {offsets = [0, 48], sizes = [12, 12], strides = [1, 1]} : vector<12x72xf32> to vector<12x12xf32>
    %157 = vector.extract_strided_slice %156 {offsets = [0, 0], sizes = [8, 12], strides = [1, 1]} : vector<12x12xf32> to vector<8x12xf32>
    %c20 = arith.constant 20 : index
    %c0_89 = arith.constant 0 : index
    %c0_90 = arith.constant 0 : index
    %158 = vector.load %arg4[%c20, %c0_89, %c0_90] : memref<30x12x128xf32, #tpu.memory_space<vmem>>, vector<1x12x128xf32>
    %159 = vector.shape_cast %158 : vector<1x12x128xf32> to vector<12x128xf32>
    %cst_91 = arith.constant dense<0.000000e+00> : vector<8x128xf32>
    %160 = tpu.matmul %157, %159, %cst_91 {dimension_numbers = #tpu.dot_dimension_numbers<[1], [0], [0], [1], [0, 0, 1, 1], [], []>} : vector<8x12xf32>, vector<12x128xf32>, vector<8x128xf32> -> vector<8x128xf32>
    %161 = arith.addf %155, %160 : vector<8x128xf32>
    %162 = vector.extract_strided_slice %156 {offsets = [1, 0], sizes = [8, 12], strides = [1, 1]} : vector<12x12xf32> to vector<8x12xf32>
    %c21 = arith.constant 21 : index
    %c0_92 = arith.constant 0 : index
    %c0_93 = arith.constant 0 : index
    %163 = vector.load %arg4[%c21, %c0_92, %c0_93] : memref<30x12x128xf32, #tpu.memory_space<vmem>>, vector<1x12x128xf32>
    %164 = vector.shape_cast %163 : vector<1x12x128xf32> to vector<12x128xf32>
    %cst_94 = arith.constant dense<0.000000e+00> : vector<8x128xf32>
    %165 = tpu.matmul %162, %164, %cst_94 {dimension_numbers = #tpu.dot_dimension_numbers<[1], [0], [0], [1], [0, 0, 1, 1], [], []>} : vector<8x12xf32>, vector<12x128xf32>, vector<8x128xf32> -> vector<8x128xf32>
    %166 = arith.addf %161, %165 : vector<8x128xf32>
    %167 = vector.extract_strided_slice %156 {offsets = [2, 0], sizes = [8, 12], strides = [1, 1]} : vector<12x12xf32> to vector<8x12xf32>
    %c22 = arith.constant 22 : index
    %c0_95 = arith.constant 0 : index
    %c0_96 = arith.constant 0 : index
    %168 = vector.load %arg4[%c22, %c0_95, %c0_96] : memref<30x12x128xf32, #tpu.memory_space<vmem>>, vector<1x12x128xf32>
    %169 = vector.shape_cast %168 : vector<1x12x128xf32> to vector<12x128xf32>
    %cst_97 = arith.constant dense<0.000000e+00> : vector<8x128xf32>
    %170 = tpu.matmul %167, %169, %cst_97 {dimension_numbers = #tpu.dot_dimension_numbers<[1], [0], [0], [1], [0, 0, 1, 1], [], []>} : vector<8x12xf32>, vector<12x128xf32>, vector<8x128xf32> -> vector<8x128xf32>
    %171 = arith.addf %166, %170 : vector<8x128xf32>
    %172 = vector.extract_strided_slice %156 {offsets = [3, 0], sizes = [8, 12], strides = [1, 1]} : vector<12x12xf32> to vector<8x12xf32>
    %c23 = arith.constant 23 : index
    %c0_98 = arith.constant 0 : index
    %c0_99 = arith.constant 0 : index
    %173 = vector.load %arg4[%c23, %c0_98, %c0_99] : memref<30x12x128xf32, #tpu.memory_space<vmem>>, vector<1x12x128xf32>
    %174 = vector.shape_cast %173 : vector<1x12x128xf32> to vector<12x128xf32>
    %cst_100 = arith.constant dense<0.000000e+00> : vector<8x128xf32>
    %175 = tpu.matmul %172, %174, %cst_100 {dimension_numbers = #tpu.dot_dimension_numbers<[1], [0], [0], [1], [0, 0, 1, 1], [], []>} : vector<8x12xf32>, vector<12x128xf32>, vector<8x128xf32> -> vector<8x128xf32>
    %176 = arith.addf %171, %175 : vector<8x128xf32>
    %177 = vector.extract_strided_slice %156 {offsets = [4, 0], sizes = [8, 12], strides = [1, 1]} : vector<12x12xf32> to vector<8x12xf32>
    %c24 = arith.constant 24 : index
    %c0_101 = arith.constant 0 : index
    %c0_102 = arith.constant 0 : index
    %178 = vector.load %arg4[%c24, %c0_101, %c0_102] : memref<30x12x128xf32, #tpu.memory_space<vmem>>, vector<1x12x128xf32>
    %179 = vector.shape_cast %178 : vector<1x12x128xf32> to vector<12x128xf32>
    %cst_103 = arith.constant dense<0.000000e+00> : vector<8x128xf32>
    %180 = tpu.matmul %177, %179, %cst_103 {dimension_numbers = #tpu.dot_dimension_numbers<[1], [0], [0], [1], [0, 0, 1, 1], [], []>} : vector<8x12xf32>, vector<12x128xf32>, vector<8x128xf32> -> vector<8x128xf32>
    %181 = arith.addf %176, %180 : vector<8x128xf32>
    %182 = vector.extract_strided_slice %52 {offsets = [0, 60], sizes = [12, 12], strides = [1, 1]} : vector<12x72xf32> to vector<12x12xf32>
    %183 = vector.extract_strided_slice %182 {offsets = [0, 0], sizes = [8, 12], strides = [1, 1]} : vector<12x12xf32> to vector<8x12xf32>
    %c25 = arith.constant 25 : index
    %c0_104 = arith.constant 0 : index
    %c0_105 = arith.constant 0 : index
    %184 = vector.load %arg4[%c25, %c0_104, %c0_105] : memref<30x12x128xf32, #tpu.memory_space<vmem>>, vector<1x12x128xf32>
    %185 = vector.shape_cast %184 : vector<1x12x128xf32> to vector<12x128xf32>
    %cst_106 = arith.constant dense<0.000000e+00> : vector<8x128xf32>
    %186 = tpu.matmul %183, %185, %cst_106 {dimension_numbers = #tpu.dot_dimension_numbers<[1], [0], [0], [1], [0, 0, 1, 1], [], []>} : vector<8x12xf32>, vector<12x128xf32>, vector<8x128xf32> -> vector<8x128xf32>
    %187 = arith.addf %181, %186 : vector<8x128xf32>
    %188 = vector.extract_strided_slice %182 {offsets = [1, 0], sizes = [8, 12], strides = [1, 1]} : vector<12x12xf32> to vector<8x12xf32>
    %c26 = arith.constant 26 : index
    %c0_107 = arith.constant 0 : index
    %c0_108 = arith.constant 0 : index
    %189 = vector.load %arg4[%c26, %c0_107, %c0_108] : memref<30x12x128xf32, #tpu.memory_space<vmem>>, vector<1x12x128xf32>
    %190 = vector.shape_cast %189 : vector<1x12x128xf32> to vector<12x128xf32>
    %cst_109 = arith.constant dense<0.000000e+00> : vector<8x128xf32>
    %191 = tpu.matmul %188, %190, %cst_109 {dimension_numbers = #tpu.dot_dimension_numbers<[1], [0], [0], [1], [0, 0, 1, 1], [], []>} : vector<8x12xf32>, vector<12x128xf32>, vector<8x128xf32> -> vector<8x128xf32>
    %192 = arith.addf %187, %191 : vector<8x128xf32>
    %193 = vector.extract_strided_slice %182 {offsets = [2, 0], sizes = [8, 12], strides = [1, 1]} : vector<12x12xf32> to vector<8x12xf32>
    %c27 = arith.constant 27 : index
    %c0_110 = arith.constant 0 : index
    %c0_111 = arith.constant 0 : index
    %194 = vector.load %arg4[%c27, %c0_110, %c0_111] : memref<30x12x128xf32, #tpu.memory_space<vmem>>, vector<1x12x128xf32>
    %195 = vector.shape_cast %194 : vector<1x12x128xf32> to vector<12x128xf32>
    %cst_112 = arith.constant dense<0.000000e+00> : vector<8x128xf32>
    %196 = tpu.matmul %193, %195, %cst_112 {dimension_numbers = #tpu.dot_dimension_numbers<[1], [0], [0], [1], [0, 0, 1, 1], [], []>} : vector<8x12xf32>, vector<12x128xf32>, vector<8x128xf32> -> vector<8x128xf32>
    %197 = arith.addf %192, %196 : vector<8x128xf32>
    %198 = vector.extract_strided_slice %182 {offsets = [3, 0], sizes = [8, 12], strides = [1, 1]} : vector<12x12xf32> to vector<8x12xf32>
    %c28 = arith.constant 28 : index
    %c0_113 = arith.constant 0 : index
    %c0_114 = arith.constant 0 : index
    %199 = vector.load %arg4[%c28, %c0_113, %c0_114] : memref<30x12x128xf32, #tpu.memory_space<vmem>>, vector<1x12x128xf32>
    %200 = vector.shape_cast %199 : vector<1x12x128xf32> to vector<12x128xf32>
    %cst_115 = arith.constant dense<0.000000e+00> : vector<8x128xf32>
    %201 = tpu.matmul %198, %200, %cst_115 {dimension_numbers = #tpu.dot_dimension_numbers<[1], [0], [0], [1], [0, 0, 1, 1], [], []>} : vector<8x12xf32>, vector<12x128xf32>, vector<8x128xf32> -> vector<8x128xf32>
    %202 = arith.addf %197, %201 : vector<8x128xf32>
    %203 = vector.extract_strided_slice %182 {offsets = [4, 0], sizes = [8, 12], strides = [1, 1]} : vector<12x12xf32> to vector<8x12xf32>
    %c29 = arith.constant 29 : index
    %c0_116 = arith.constant 0 : index
    %c0_117 = arith.constant 0 : index
    %204 = vector.load %arg4[%c29, %c0_116, %c0_117] : memref<30x12x128xf32, #tpu.memory_space<vmem>>, vector<1x12x128xf32>
    %205 = vector.shape_cast %204 : vector<1x12x128xf32> to vector<12x128xf32>
    %cst_118 = arith.constant dense<0.000000e+00> : vector<8x128xf32>
    %206 = tpu.matmul %203, %205, %cst_118 {dimension_numbers = #tpu.dot_dimension_numbers<[1], [0], [0], [1], [0, 0, 1, 1], [], []>} : vector<8x12xf32>, vector<12x128xf32>, vector<8x128xf32> -> vector<8x128xf32>
    %207 = arith.addf %202, %206 : vector<8x128xf32>
    %c0_119 = arith.constant 0 : index
    %c0_120 = arith.constant 0 : index
    %208 = vector.load %arg5[%c0_119, %c0_120] : memref<1x128xf32, #tpu.memory_space<vmem>>, vector<1x128xf32>
    %209 = vector.broadcast %208 : vector<1x128xf32> to vector<8x128xf32>
    %210 = arith.addf %207, %209 : vector<8x128xf32>
    %cst_121 = arith.constant 0.000000e+00 : f32
    %211 = vector.broadcast %cst_121 : f32 to vector<8x128xf32>
    %212 = arith.maximumf %210, %211 : vector<8x128xf32>
    %213 = vector.extract_strided_slice %212 {offsets = [0, 0], sizes = [8, 127], strides = [1, 1]} : vector<8x128xf32> to vector<8x127xf32>
    %214 = vector.extract_strided_slice %212 {offsets = [0, 1], sizes = [8, 127], strides = [1, 1]} : vector<8x128xf32> to vector<8x127xf32>
    %215 = arith.maximumf %213, %214 : vector<8x127xf32>
    %216 = vector.extract_strided_slice %215 {offsets = [0, 0], sizes = [7, 127], strides = [1, 1]} : vector<8x127xf32> to vector<7x127xf32>
    %217 = vector.extract_strided_slice %215 {offsets = [1, 0], sizes = [7, 127], strides = [1, 1]} : vector<8x127xf32> to vector<7x127xf32>
    %218 = arith.maximumf %216, %217 : vector<7x127xf32>
    %219 = tpu.iota {dimensions = array<i32: 0>} : vector<4x7xi32>
    %220 = tpu.iota {dimensions = array<i32: 1>} : vector<4x7xi32>
    %c2_i32_122 = arith.constant 2 : i32
    %221 = vector.broadcast %c2_i32_122 : i32 to vector<4x7xi32>
    %222 = arith.muli %221, %219 : vector<4x7xi32>
    %223 = arith.cmpi eq, %220, %222 : vector<4x7xi32>
    %224 = arith.extui %223 : vector<4x7xi1> to vector<4x7xi32>
    %225 = arith.sitofp %224 : vector<4x7xi32> to vector<4x7xf32>
    %226 = tpu.iota {dimensions = array<i32: 0>} : vector<127x64xi32>
    %227 = tpu.iota {dimensions = array<i32: 1>} : vector<127x64xi32>
    %c2_i32_123 = arith.constant 2 : i32
    %228 = vector.broadcast %c2_i32_123 : i32 to vector<127x64xi32>
    %229 = arith.muli %228, %227 : vector<127x64xi32>
    %230 = arith.cmpi eq, %226, %229 : vector<127x64xi32>
    %231 = arith.extui %230 : vector<127x64xi1> to vector<127x64xi32>
    %232 = arith.sitofp %231 : vector<127x64xi32> to vector<127x64xf32>
    %cst_124 = arith.constant dense<0.000000e+00> : vector<4x127xf32>
    %233 = tpu.matmul %225, %218, %cst_124 {dimension_numbers = #tpu.dot_dimension_numbers<[1], [0], [0], [1], [0, 0, 1, 1], [], []>} : vector<4x7xf32>, vector<7x127xf32>, vector<4x127xf32> -> vector<4x127xf32>
    %cst_125 = arith.constant dense<0.000000e+00> : vector<4x64xf32>
    %234 = tpu.matmul %233, %232, %cst_125 {dimension_numbers = #tpu.dot_dimension_numbers<[1], [0], [0], [1], [0, 0, 1, 1], [], []>} : vector<4x127xf32>, vector<127x64xf32>, vector<4x64xf32> -> vector<4x64xf32>
    %235 = vector.extract_strided_slice %234 {offsets = [0, 0], sizes = [1, 64], strides = [1, 1]} : vector<4x64xf32> to vector<1x64xf32>
    %c0_126 = arith.constant 0 : index
    %c0_127 = arith.constant 0 : index
    %c0_128 = arith.constant 0 : index
    %236 = vector.load %arg6[%c0_126, %c0_127, %c0_128] : memref<4x64x120xf32, #tpu.memory_space<vmem>>, vector<1x64x120xf32>
    %237 = vector.shape_cast %236 : vector<1x64x120xf32> to vector<64x120xf32>
    %cst_129 = arith.constant dense<0.000000e+00> : vector<1x120xf32>
    %238 = tpu.matmul %235, %237, %cst_129 {dimension_numbers = #tpu.dot_dimension_numbers<[1], [0], [0], [1], [0, 0, 1, 1], [], []>} : vector<1x64xf32>, vector<64x120xf32>, vector<1x120xf32> -> vector<1x120xf32>
    %239 = vector.extract_strided_slice %234 {offsets = [1, 0], sizes = [1, 64], strides = [1, 1]} : vector<4x64xf32> to vector<1x64xf32>
    %c1_130 = arith.constant 1 : index
    %c0_131 = arith.constant 0 : index
    %c0_132 = arith.constant 0 : index
    %240 = vector.load %arg6[%c1_130, %c0_131, %c0_132] : memref<4x64x120xf32, #tpu.memory_space<vmem>>, vector<1x64x120xf32>
    %241 = vector.shape_cast %240 : vector<1x64x120xf32> to vector<64x120xf32>
    %cst_133 = arith.constant dense<0.000000e+00> : vector<1x120xf32>
    %242 = tpu.matmul %239, %241, %cst_133 {dimension_numbers = #tpu.dot_dimension_numbers<[1], [0], [0], [1], [0, 0, 1, 1], [], []>} : vector<1x64xf32>, vector<64x120xf32>, vector<1x120xf32> -> vector<1x120xf32>
    %243 = arith.addf %238, %242 : vector<1x120xf32>
    %244 = vector.extract_strided_slice %234 {offsets = [2, 0], sizes = [1, 64], strides = [1, 1]} : vector<4x64xf32> to vector<1x64xf32>
    %c2_134 = arith.constant 2 : index
    %c0_135 = arith.constant 0 : index
    %c0_136 = arith.constant 0 : index
    %245 = vector.load %arg6[%c2_134, %c0_135, %c0_136] : memref<4x64x120xf32, #tpu.memory_space<vmem>>, vector<1x64x120xf32>
    %246 = vector.shape_cast %245 : vector<1x64x120xf32> to vector<64x120xf32>
    %cst_137 = arith.constant dense<0.000000e+00> : vector<1x120xf32>
    %247 = tpu.matmul %244, %246, %cst_137 {dimension_numbers = #tpu.dot_dimension_numbers<[1], [0], [0], [1], [0, 0, 1, 1], [], []>} : vector<1x64xf32>, vector<64x120xf32>, vector<1x120xf32> -> vector<1x120xf32>
    %248 = arith.addf %243, %247 : vector<1x120xf32>
    %249 = vector.extract_strided_slice %234 {offsets = [3, 0], sizes = [1, 64], strides = [1, 1]} : vector<4x64xf32> to vector<1x64xf32>
    %c3_138 = arith.constant 3 : index
    %c0_139 = arith.constant 0 : index
    %c0_140 = arith.constant 0 : index
    %250 = vector.load %arg6[%c3_138, %c0_139, %c0_140] : memref<4x64x120xf32, #tpu.memory_space<vmem>>, vector<1x64x120xf32>
    %251 = vector.shape_cast %250 : vector<1x64x120xf32> to vector<64x120xf32>
    %cst_141 = arith.constant dense<0.000000e+00> : vector<1x120xf32>
    %252 = tpu.matmul %249, %251, %cst_141 {dimension_numbers = #tpu.dot_dimension_numbers<[1], [0], [0], [1], [0, 0, 1, 1], [], []>} : vector<1x64xf32>, vector<64x120xf32>, vector<1x120xf32> -> vector<1x120xf32>
    %253 = arith.addf %248, %252 : vector<1x120xf32>
    %c0_142 = arith.constant 0 : index
    %c0_143 = arith.constant 0 : index
    %254 = vector.load %arg7[%c0_142, %c0_143] : memref<1x120xf32, #tpu.memory_space<vmem>>, vector<1x120xf32>
    %255 = arith.addf %253, %254 : vector<1x120xf32>
    %cst_144 = arith.constant 0.000000e+00 : f32
    %256 = vector.broadcast %cst_144 : f32 to vector<1x120xf32>
    %257 = arith.maximumf %255, %256 : vector<1x120xf32>
    %c0_145 = arith.constant 0 : index
    %c0_146 = arith.constant 0 : index
    %258 = vector.load %arg8[%c0_145, %c0_146] : memref<120x84xf32, #tpu.memory_space<vmem>>, vector<120x84xf32>
    %cst_147 = arith.constant dense<0.000000e+00> : vector<1x84xf32>
    %259 = tpu.matmul %257, %258, %cst_147 {dimension_numbers = #tpu.dot_dimension_numbers<[1], [0], [0], [1], [0, 0, 1, 1], [], []>} : vector<1x120xf32>, vector<120x84xf32>, vector<1x84xf32> -> vector<1x84xf32>
    %c0_148 = arith.constant 0 : index
    %c0_149 = arith.constant 0 : index
    %260 = vector.load %arg9[%c0_148, %c0_149] : memref<1x84xf32, #tpu.memory_space<vmem>>, vector<1x84xf32>
    %261 = arith.addf %259, %260 : vector<1x84xf32>
    %cst_150 = arith.constant 0.000000e+00 : f32
    %262 = vector.broadcast %cst_150 : f32 to vector<1x84xf32>
    %263 = arith.maximumf %261, %262 : vector<1x84xf32>
    %c0_151 = arith.constant 0 : index
    %c0_152 = arith.constant 0 : index
    %264 = vector.load %arg10[%c0_151, %c0_152] : memref<84x10xf32, #tpu.memory_space<vmem>>, vector<84x10xf32>
    %cst_153 = arith.constant dense<0.000000e+00> : vector<1x10xf32>
    %265 = tpu.matmul %263, %264, %cst_153 {dimension_numbers = #tpu.dot_dimension_numbers<[1], [0], [0], [1], [0, 0, 1, 1], [], []>} : vector<1x84xf32>, vector<84x10xf32>, vector<1x10xf32> -> vector<1x10xf32>
    %c0_154 = arith.constant 0 : index
    %c0_155 = arith.constant 0 : index
    %266 = vector.load %arg11[%c0_154, %c0_155] : memref<1x10xf32, #tpu.memory_space<vmem>>, vector<1x10xf32>
    %267 = arith.addf %265, %266 : vector<1x10xf32>
    %cst_156 = arith.constant dense<0xFF800000> : vector<1xf32>
    %268 = vector.multi_reduction <maximumf>, %267, %cst_156 [1] : vector<1x10xf32> to vector<1xf32>
    %269 = vector.shape_cast %268 : vector<1xf32> to vector<1x1xf32>
    %270 = vector.broadcast %269 : vector<1x1xf32> to vector<1x10xf32>
    %271 = arith.subf %267, %270 : vector<1x10xf32>
    %272 = math.exp %271 : vector<1x10xf32>
    %cst_157 = arith.constant dense<0.000000e+00> : vector<1xf32>
    %273 = vector.multi_reduction <add>, %272, %cst_157 [1] : vector<1x10xf32> to vector<1xf32>
    %274 = vector.shape_cast %273 : vector<1xf32> to vector<1x1xf32>
    %275 = math.log %274 : vector<1x1xf32>
    %276 = vector.broadcast %275 : vector<1x1xf32> to vector<1x10xf32>
    %277 = arith.subf %271, %276 : vector<1x10xf32>
    %c0_158 = arith.constant 0 : index
    %c0_159 = arith.constant 0 : index
    %c0_160 = arith.constant 0 : index
    %278 = vector.load %arg12[%c0_158, %c0_159, %c0_160] : memref<1x1x10xf32, #tpu.memory_space<vmem>>, vector<1x1x10xf32>
    %279 = vector.shape_cast %278 : vector<1x1x10xf32> to vector<1x10xf32>
    %280 = vector.shape_cast %277 : vector<1x10xf32> to vector<1x1x10xf32>
    tpu.vector_store %arg12[%c0_158, %c0_159, %c0_160], %280 {strides = array<i32>} : memref<1x1x10xf32, #tpu.memory_space<vmem>>, vector<1x1x10xf32>,
    return
  }
  func.func @transform_0(%arg0: i32) -> (i32, i32, i32, i32) {
    %c0_i32 = arith.constant 0 : i32
    %c0_i32_0 = arith.constant 0 : i32
    %c0_i32_1 = arith.constant 0 : i32
    %c0_i32_2 = arith.constant 0 : i32
    return %arg0, %c0_i32, %c0_i32_0, %c0_i32_1 : i32, i32, i32, i32
  }
  func.func @transform_1(%arg0: i32) -> (i32, i32, i32) {
    %c0_i32 = arith.constant 0 : i32
    %c0_i32_0 = arith.constant 0 : i32
    %c0_i32_1 = arith.constant 0 : i32
    %c0_i32_2 = arith.constant 0 : i32
    return %c0_i32, %c0_i32_0, %c0_i32_1 : i32, i32, i32
  }
  func.func @transform_2(%arg0: i32) -> (i32, i32) {
    %c0_i32 = arith.constant 0 : i32
    %c0_i32_0 = arith.constant 0 : i32
    %c0_i32_1 = arith.constant 0 : i32
    return %c0_i32, %c0_i32_0 : i32, i32
  }
  func.func @transform_3(%arg0: i32) -> (i32, i32, i32) {
    %c0_i32 = arith.constant 0 : i32
    %c0_i32_0 = arith.constant 0 : i32
    %c0_i32_1 = arith.constant 0 : i32
    %c0_i32_2 = arith.constant 0 : i32
    return %c0_i32, %c0_i32_0, %c0_i32_1 : i32, i32, i32
  }
  func.func @transform_4(%arg0: i32) -> (i32, i32) {
    %c0_i32 = arith.constant 0 : i32
    %c0_i32_0 = arith.constant 0 : i32
    %c0_i32_1 = arith.constant 0 : i32
    return %c0_i32, %c0_i32_0 : i32, i32
  }
  func.func @transform_5(%arg0: i32) -> (i32, i32, i32) {
    %c0_i32 = arith.constant 0 : i32
    %c0_i32_0 = arith.constant 0 : i32
    %c0_i32_1 = arith.constant 0 : i32
    %c0_i32_2 = arith.constant 0 : i32
    return %c0_i32, %c0_i32_0, %c0_i32_1 : i32, i32, i32
  }
  func.func @transform_6(%arg0: i32) -> (i32, i32) {
    %c0_i32 = arith.constant 0 : i32
    %c0_i32_0 = arith.constant 0 : i32
    %c0_i32_1 = arith.constant 0 : i32
    return %c0_i32, %c0_i32_0 : i32, i32
  }
  func.func @transform_7(%arg0: i32) -> (i32, i32) {
    %c0_i32 = arith.constant 0 : i32
    %c0_i32_0 = arith.constant 0 : i32
    %c0_i32_1 = arith.constant 0 : i32
    return %c0_i32, %c0_i32_0 : i32, i32
  }
  func.func @transform_8(%arg0: i32) -> (i32, i32) {
    %c0_i32 = arith.constant 0 : i32
    %c0_i32_0 = arith.constant 0 : i32
    %c0_i32_1 = arith.constant 0 : i32
    return %c0_i32, %c0_i32_0 : i32, i32
  }
  func.func @transform_9(%arg0: i32) -> (i32, i32) {
    %c0_i32 = arith.constant 0 : i32
    %c0_i32_0 = arith.constant 0 : i32
    %c0_i32_1 = arith.constant 0 : i32
    return %c0_i32, %c0_i32_0 : i32, i32
  }
  func.func @transform_10(%arg0: i32) -> (i32, i32) {
    %c0_i32 = arith.constant 0 : i32
    %c0_i32_0 = arith.constant 0 : i32
    %c0_i32_1 = arith.constant 0 : i32
    return %c0_i32, %c0_i32_0 : i32, i32
  }
  func.func @transform_11(%arg0: i32) -> (i32, i32, i32) {
    %c0_i32 = arith.constant 0 : i32
    %c0_i32_0 = arith.constant 0 : i32
    %c0_i32_1 = arith.constant 0 : i32
    return %arg0, %c0_i32, %c0_i32_0 : i32, i32, i32
  }
}

</mosaic_0001>

<bundles_post_ra>
// kernel: lenet_forward.1
= control target key start
LH: loop header
LB: loop body
LE: loop exit
PB: predicated region body
PF: predicated region fallthrough
CT: control target
= control target key end

     0   :  { %16 = vsyncpa [#allocation3], 0  ;;  %s7001_s0 = inlined_call_operand.vmem [shape: f32[2,1,28,28], index: 0, kind: input, shape index: {}]   ;;  %s7002_s1 = inlined_call_operand.vmem [shape: f32[5,28,144], index: 1, kind: input, shape index: {}]   ;;  %s7003_s2 = inlined_call_operand.vmem [shape: f32[1,144], index: 2, kind: input, shape index: {}]   ;;  %s7004_s3 = inlined_call_operand.vmem [shape: f32[30,12,128], index: 3, kind: input, shape index: {}]   ;;  %s7005_s4 = inlined_call_operand.vmem [shape: f32[1,128], index: 4, kind: input, shape index: {}]   ;;  %s7006_s5 = inlined_call_operand.vmem [shape: f32[4,64,120], index: 5, kind: input, shape index: {}]   ;;  %s7007_s6 = inlined_call_operand.vmem [shape: f32[1,120], index: 6, kind: input, shape index: {}]   ;;  %s7008_s7 = inlined_call_operand.vmem [shape: f32[120,84], index: 7, kind: input, shape index: {}]   ;;  %s7009_s8 = inlined_call_operand.vmem [shape: f32[1,84], index: 8, kind: input, shape index: {}]   ;;  %s7010_s9 = inlined_call_operand.vmem [shape: f32[84,10], index: 9, kind: input, shape index: {}]   ;;  %s7011_s10 = inlined_call_operand.vmem [shape: f32[1,10], index: 10, kind: input, shape index: {}]   ;;  %s7012_s11 = inlined_call_operand.hbm [shape: f32[2,1,10], index: 11, kind: output, shape index: {}]  }
   0x1   :  { %18 = vsyncpa [#allocation3 + $0x1], 0  ;;  %s5878_s17 = smov 0   ;;  %s5880_s18 = smov 0  }
   0x2   :  { %s5882_s19 = smov 0   ;;  %s5884_s20 = smov 0  }
   0x3 LB: > { %7019 = sst [smem:[#allocation5_spill]] %s5799_s19  ;;  %s5899_s21 = sadd.s32 4294967295, %s5803_s20   ;;  %s5803_s20 = sphi %s5884_s20, %s7044_s20   ;;  %s5799_s19 = sphi %s5882_s19, %s7046_s19   ;;  %s5795_s18 = sphi %s5880_s18, %s7048_s18   ;;  %s5791_s17 = sphi %s5878_s17, %s7047_s17  }
   0x4   : > { %s4504_s22 = sadd.s32 4294967294, %s5803_s20   ;;  %s5903_s23 = sadd.s32 1, %s5803_s20  }
   0x5   : > { %7020 = sst [smem:[#allocation6_spill]] %s5903_s23  ;;  %s267_s24 = sadd.s32 1, %s5799_s19 }
   0x6   : > { %s264_s25 = ssub.s32 %s5803_s20, %s5903_s23  ;;  %p277_p0 = scmp.ne.s32.totalorder %s5799_s19, %s5795_s18 }
   0x7   : > { %p265_p1 = scmp.eq.s32.totalorder %s264_s25, 0  ;;  %p278_p2 = scmp.eq.s32.totalorder %s5899_s21, 1 }
   0x8   : > { %p283_p3 = scmp.ne.s32.totalorder %s5795_s18, %s5791_s17  ;;  %p284_p4 = scmp.eq.s32.totalorder %s4504_s22, 1 }
   0x9   : > { %s5914_s26 = scalar_select %p265_p1, %s5799_s19, %s267_s24  }
   0xa   : > { %p5916_p5 = por %p278_p2, %p277_p0  ;;  %p5920_p6 = por %p284_p4, %p283_p3 }
   0xb   : > { %7021 = sst [smem:[#allocation7_spill]] %s5914_s26  ;;  %p4507_p7 = scmp.ge.s32.totalorder %s5803_s20, 1 }
   0xc   : > { %p340_p8 = scmp.lt.s32.totalorder %s5803_s20, 3 }
   0xe   : > { %p341_p9 = pnand %p4507_p7, %p340_p8 }
   0xf   : > { %v4511_v0 = vld [vmem:[%s7002_s1 + $0x48] sm:$0xff] (!%p341_p9)  ;;  %v4513_v1 = vld [vmem:[%s7002_s1 + $0x58] sm:$0xff] (!%p341_p9)  ;;  %v4510_v2 = vld [vmem:[%s7002_s1 + $0x40] sm:$0xff] (!%p341_p9)  ;;  %vm7018_vm0 = vcmask (!%p341_p9), 1043456   ;;  %v5805_v7 = vmov (!%p341_p9), 0.0   ;;  %p379_p10 = scmp.lt.s32.totalorder (!%p341_p9), %s5899_s21, 1 }
  0x10   : > { %344 = sbr.rel (%p341_p9) target bundleno = 2807 (0xaf7), region = 64  ;;  %v5341_v3 = vpack.c.bf16 (!%p341_p9), %v4513_v1, %v4511_v0  ;;  %v4512_v4 = vld [vmem:[%s7002_s1 + $0x50] sm:$0xff] (!%p341_p9)  ;;  %v4515_v5 = vld [vmem:[%s7002_s1 + $0x68] sm:$0xff] (!%p341_p9)  ;;  %v4517_v6 = vld [vmem:[%s7002_s1 + $0x78] sm:$0xf] (!%p341_p9)  ;;  %495 = vmatprep.mubr.f32.mxu0 (!%p341_p9), %v5805_v7  ;;  %1209 = vmatprep.mubr.f32.mxu1 (!%p341_p9), %v5805_v7  ;;  %vm5806_vm1 = vmmov (!%p341_p9), 1  }
  0x11   : > { %v5343_v8 = vpack.c.bf16 (!%p341_p9), %v4512_v4, %v4510_v2  ;;  %v5345_v9 = vpack.c.bf16 (!%p341_p9), %v4517_v6, %v4515_v5  ;;  %vm5948_vm2 = vmpackc.low (!%p341_p9), %vm7018_vm0, %vm5806_vm1  ;;  %v4514_v11 = vld [vmem:[%s7002_s1 + $0x60] sm:$0xff] (!%p341_p9)  ;;  %v4516_v12 = vld [vmem:[%s7002_s1 + $0x70] sm:$0xf] (!%p341_p9)  ;;  %vm409_vm3 = vcmask (!%p341_p9), 1046528   ;;  %vm417_vm4 = vcmask (!%p341_p9), 228352   ;;  %s5807_s26 = smov (!%p341_p9), 127  }
  0x12   : > { %5342 = vmatprep.subr.bf16.mxu0 (!%p341_p9), %v5341_v3  ;;  %v389_v13 = vld [vmem:[%s7002_s1 + $0x8] sm:$0xff] (!%p341_p9)  ;;  %v391_v14 = vld [vmem:[%s7002_s1 + $0x18] sm:$0xff] (!%p341_p9)  ;;  %v5348_v15 = vpack.c.bf16 (!%p341_p9), %v4516_v12, %v4514_v11  ;;  %v388_v17 = vld [vmem:[%s7002_s1] sm:$0xff] (!%p341_p9)  ;;  %vm618_vm5 = vcmask (!%p341_p9), 1045504   ;;  %vm7017_vm6 = vcmask (!%p341_p9), 1044480   ;;  %vm7016_vm8 = vcmask (!%p341_p9), 1039360  }
  0x13   : > { %5344 = vmatpush1.bf16.msra.mxu0 (!%p341_p9), %v5343_v8  ;;  %v5351_v16 = vpack.c.bf16 (!%p341_p9), %v391_v14, %v389_v13  ;;  %v390_v18 = vld [vmem:[%s7002_s1 + $0x10] sm:$0xff] (!%p341_p9)  ;;  %v393_v19 = vld [vmem:[%s7002_s1 + $0x28] sm:$0xff] (!%p341_p9)  ;;  %v395_v20 = vld [vmem:[%s7002_s1 + $0x38] sm:$0xf] (!%p341_p9)  ;;  %vm1132_vm12 = vcmask (!%p341_p9), 187392   ;;  %s5814_s22 = smov (!%p341_p9), 92  }
  0x14   : > { %5347 = vmatprep.subr.msk.bf16.mxu0 (!%p341_p9), %vm5948_vm2, %v5345_v9  ;;  %v5353_v26 = vpack.c.bf16 (!%p341_p9), %v390_v18, %v388_v17  ;;  %v5355_v29 = vpack.c.bf16 (!%p341_p9), %v395_v20, %v393_v19  ;;  %v392_v30 = vld [vmem:[%s7002_s1 + $0x20] sm:$0xff] (!%p341_p9)  ;;  %v394_v31 = vld [vmem:[%s7002_s1 + $0x30] sm:$0xf] (!%p341_p9)  ;;  %v4529_v33 = vld [vmem:[%s7002_s1 + $0x88] sm:$0xff] (!%p341_p9)  ;;  %s5815_s24 = smov (!%p341_p9), 80   ;;  %s5816_s29 = smov (!%p341_p9), 68  }
  0x15   : > { %v4531_v34 = vld [vmem:[%s7002_s1 + $0x98] sm:$0xff] (!%p341_p9)  ;;  %v5358_v37 = vpack.c.bf16 (!%p341_p9), %v394_v31, %v392_v30  ;;  %v4528_v40 = vld [vmem:[%s7002_s1 + $0x80] sm:$0xff] (!%p341_p9)  ;;  %v4530_v41 = vld [vmem:[%s7002_s1 + $0x90] sm:$0xff] (!%p341_p9) }
  0x16   : > { %v5361_v38 = vpack.c.bf16 (!%p341_p9), %v4531_v34, %v4529_v33  ;;  %v4533_v42 = vld [vmem:[%s7002_s1 + $0xa8] sm:$0xff] (!%p341_p9)  ;;  %v4535_v43 = vld [vmem:[%s7002_s1 + $0xb8] sm:$0xf] (!%p341_p9)  ;;  %v5363_v44 = vpack.c.bf16 (!%p341_p9), %v4530_v41, %v4528_v40  ;;  %v4532_v46 = vld [vmem:[%s7002_s1 + $0xa0] sm:$0xff] (!%p341_p9) }
  0x17   : > { %s380_s16 = scalar_select %p379_p10, %s5899_s21, 1  ;;  %5350 = vmatpush1.bf16.msk.msra.mxu0 %vm5948_vm2, %v5348_v15  ;;  %v5365_v45 = vpack.c.bf16 %v4535_v43, %v4533_v42  ;;  %v4534_v47 = vld [vmem:[%s7002_s1 + $0xb0] sm:$0xf]  ;;  %v4542_v48 = vld [vmem:[%s7002_s1 + $0xc8] sm:$0xff]  ;;  %v4544_v49 = vld [vmem:[%s7002_s1 + $0xd8] sm:$0xff] }
  0x18   : > { %5352 = vmatprep.subr.bf16.mxu0 %v5351_v16  ;;  %v5368_v50 = vpack.c.bf16 %v4534_v47, %v4532_v46  ;;  %v5371_v51 = vpack.c.bf16 %v4544_v49, %v4542_v48  ;;  %v4541_v54 = vld [vmem:[%s7002_s1 + $0xc0] sm:$0xff]  ;;  %v4543_v55 = vld [vmem:[%s7002_s1 + $0xd0] sm:$0xff]  ;;  %v4546_v56 = vld [vmem:[%s7002_s1 + $0xe8] sm:$0xff] }
  0x19   : > { %s4783_s30 = sshll.u32 %s380_s16, 5  ;;  %v4548_v57 = vld [vmem:[%s7002_s1 + $0xf8] sm:$0xf]  ;;  %v5373_v59 = vpack.c.bf16 %v4543_v55, %v4541_v54  ;;  %v4545_v62 = vld [vmem:[%s7002_s1 + $0xe0] sm:$0xff]  ;;  %v4547_v63 = vld [vmem:[%s7002_s1 + $0xf0] sm:$0xf] }
  0x1a   : > { %s383_s25 = scalar_lea.vmem %s7001_s0, %s4783_s30  ;;  %v5375_v61 = vpack.c.bf16 %v4548_v57, %v4546_v56  ;;  %v4555_v0 = vld [vmem:[%s7002_s1 + $0x108] sm:$0xff]  ;;  %v4557_v1 = vld [vmem:[%s7002_s1 + $0x118] sm:$0xff]  ;;  %v5378_v4 = vpack.c.bf16 %v4547_v63, %v4545_v62  ;;  %v4554_v11 = vld [vmem:[%s7002_s1 + $0x100] sm:$0xff]  ;;  %s377_s16 = sand.u32 1, %s5795_s18  }
  0x1b   : > { %v5982_v21 = vld [vmem:[%s383_s25] sm:$0xff]  ;;  %v5984_v22 = vld [vmem:[%s383_s25 + $0x8] sm:$0xff]  ;;  %v5986_v23 = vld [vmem:[%s383_s25 + $0x10] sm:$0xff]  ;;  %v5381_v5 = vpack.c.bf16 %v4557_v1, %v4555_v0  ;;  %v5809_v0 = vmov 1.0   ;;  %s4780_s30 = sshll.u32 %s5899_s21, 4  ;;  %s5817_s21 = smov [#allocation2]  }
  0x1c   : > { %v410_v24 = vrot.slane %v5982_v21, 1  ;;  %v411_v25 = vrot.slane %v5984_v22, 1  ;;  %v413_v27 = vrot.slane %v5986_v23, 1  ;;  %v5993_v28 = vld [vmem:[%s383_s25 + $0x18] sm:$0xf]  ;;  %v619_v52 = vrot.slane %v5982_v21, 2  ;;  %s6958_s15 = scalar_lea.hbm %s7012_s11, %s4780_s30 }
  0x1d   : > { %v415_v36 = vrot.slane %v5993_v28, 1  ;;  %v620_v53 = vrot.slane %v5984_v22, 2  ;;  %v622_v60 = vrot.slane %v5986_v23, 2  ;;  %v624_v3 = vrot.slane %v5993_v28, 2  ;;  %v4556_v12 = vld [vmem:[%s7002_s1 + $0x110] sm:$0xff]  ;;  %v4559_v13 = vld [vmem:[%s7002_s1 + $0x128] sm:$0xff] }
  0x1e   : > { %v412_v32 = vsel %vm409_vm3, %v410_v24, %v411_v25  ;;  %v414_v35 = vsel %vm409_vm3, %v411_v25, %v413_v27  ;;  %v737_v8 = vrot.slane %v5982_v21, 3  ;;  %v738_v9 = vrot.slane %v5984_v22, 3  ;;  %v4561_v14 = vld [vmem:[%s7002_s1 + $0x138] sm:$0xf]  ;;  %v4558_v19 = vld [vmem:[%s7002_s1 + $0x120] sm:$0xff]  ;;  %s5812_s25 = smov 116  }
  0x1f   : > { %4520 = vmatmul.mubr.msk.f32.vlgmr.msra.gmra.mrb[0].mxu0 %vm417_vm4, %v412_v32  ;;  %v416_v39 = vsel %vm409_vm3, %v413_v27, %v415_v36  ;;  %v621_v58 = vsel %vm618_vm5, %v619_v52, %v620_v53  ;;  %v623_v2 = vsel %vm618_vm5, %v620_v53, %v622_v60  ;;  %v625_v6 = vsel %vm618_vm5, %v622_v60, %v624_v3  ;;  %v4560_v20 = vld [vmem:[%s7002_s1 + $0x130] sm:$0xf]  ;;  %v962_v36 = vld [vmem:[%s7003_s2] sm:$0x3] }
  0x20   : > { %501 = vmatprep.mubr.f32.mxu0 %v5805_v7  ;;  %5354 = vmatpush1.bf16.msra.mxu0 %v5353_v26  ;;  %v739_v15 = vsel %vm7017_vm6, %v737_v8, %v738_v9  ;;  %v5383_v16 = vpack.c.bf16 %v4556_v12, %v4554_v11  ;;  %v740_v17 = vrot.slane %v5986_v23, 3  ;;  %v5385_v18 = vpack.c.bf16 %v4561_v14, %v4559_v13 }
  0x21   : > { %5357 = vmatprep.subr.msk.bf16.mxu0 %vm5948_vm2, %v5355_v29  ;;  %v742_v25 = vrot.slane %v5993_v28, 3  ;;  %v5388_v26 = vpack.c.bf16 %v4560_v20, %v4558_v19  ;;  %v854_v29 = vrot.slane %v5982_v21, 4  ;;  %v855_v30 = vrot.slane %v5984_v22, 4 }
  0x22   : > { %v741_v24 = vsel %vm7017_vm6, %v738_v9, %v740_v17  ;;  %v857_v32 = vrot.slane %v5986_v23, 4  ;;  %v859_v34 = vrot.slane %v5993_v28, 4 }
  0x23   : > { %4521 = vmatmul.mubr.msk.f32.gmra.mrb[2].mxu0 %vm417_vm4, %v414_v35  ;;  %v743_v27 = vsel %vm7017_vm6, %v740_v17, %v742_v25  ;;  %v856_v31 = vsel %vm7018_vm0, %v854_v29, %v855_v30 }
  0x24   : > { %507 = vmatprep.mubr.f32.mxu0 %v5805_v7  ;;  %5360 = vmatpush1.bf16.msk.msra.mxu0 %vm5948_vm2, %v5358_v37  ;;  %v858_v33 = vsel %vm7018_vm0, %v855_v30, %v857_v32 }
  0x25   : > { %5362 = vmatprep.subr.bf16.mxu0 %v5361_v38 }
  0x27   : > { %4522 = vmatmul.mubr.msk.f32.gmra.mrb[4].mxu0 %vm417_vm4, %v416_v39 }
  0x28   : > { %590 = vmatprep.mubr.f32.mxu0 %v5805_v7 }
  0x2b   : > { %4525 = vmatmul.mubr.msk.f32.vlgmr.msra.gmra.mrb[0].mxu0 %vm417_vm4, %v5982_v21  ;;  %v860_v21 = vsel %vm7018_vm0, %v857_v32, %v859_v34 }
  0x2c   : > { %596 = vmatprep.mubr.f32.mxu0 %v5805_v7  ;;  %5364 = vmatpush1.bf16.msra.mxu0 %v5363_v44 }
  0x2d   : > { %5367 = vmatprep.subr.msk.bf16.mxu0 %vm5948_vm2, %v5365_v45 }
  0x2f   : > { %4526 = vmatmul.mubr.msk.f32.gmra.mrb[2].mxu0 %vm417_vm4, %v5984_v22  ;;  %v964_v22 = vlaneseq }
  0x30   : > { %602 = vmatprep.mubr.f32.mxu0 %v5805_v7  ;;  %5370 = vmatpush1.bf16.msk.msra.mxu0 %vm5948_vm2, %v5368_v50 }
  0x31   : > { %5372 = vmatprep.subr.bf16.mxu0 %v5371_v51  ;;  %v6146_v35 = vshrl.u32 %v964_v22, 7  ;;  %v1052_v60 = vand.u32 127, %v964_v22 }
  0x33   : > { %4527 = vmatmul.mubr.msk.f32.gmra.mrb[4].mxu0 %vm417_vm4, %v5986_v23  ;;  %v966_v23 = vsub.s32 0, %v6146_v35  ;;  %v970_v37 = vsub.s32 1, %v6146_v35  ;;  %v6161_v62 = vadd.s32 120, %v6146_v35  ;;  %v1053_v34 = vmul.u32 2, %v6146_v35 }
  0x34   : > { %702 = vmatprep.mubr.f32.mxu0 %v5805_v7 }
  0x35   : > { %v967_v28 = vrot.slane %v962_v36, %v966_v23  ;;  %v971_v38 = vrot.slane %v962_v36, %v970_v37  ;;  %v1050_v36 = vadd.s32 8, %v6146_v35  ;;  %vm1055_vm9 = vcmp.eq.s32.totalorder %v1052_v60, %v1053_v34 }
  0x37   : > { %4538 = vmatmul.mubr.msk.f32.vlgmr.msra.gmra.mrb[0].mxu0 %vm417_vm4, %v621_v58 }
  0x38   : > { %708 = vmatprep.mubr.f32.mxu0 %v5805_v7  ;;  %5374 = vmatpush1.bf16.msra.mxu0 %v5373_v59  ;;  %v5808_v59 = vmov 0.0|0.0  }
  0x39   : > { %5377 = vmatprep.subr.msk.bf16.mxu0 %vm5948_vm2, %v5375_v61  ;;  %v6158_v61 = vmul.u32 2, %v1052_v60 }
  0x3b   : > { %4539 = vmatmul.mubr.msk.f32.gmra.mrb[2].mxu0 %vm417_vm4, %v623_v2  ;;  %vm1093_vm7 = vcmp.eq.s32.totalorder %v6161_v62, %v6158_v61  ;;  %vm1078_vm10 = vcmp.eq.s32.totalorder %v6146_v35, %v6158_v61  ;;  %vm1079_vm11 = vcmp.eq.s32.totalorder %v1050_v36, %v6158_v61 }
  0x3c   : > { %714 = vmatprep.mubr.f32.mxu0 %v5805_v7  ;;  %5380 = vmatpush1.bf16.msk.msra.mxu0 %vm5948_vm2, %v5378_v4  ;;  %v4584_v63 = vsel %vm1093_vm7, 1.0, %v5805_v7  ;;  %vm6190_vm14 = vmpackc.low %vm1079_vm11, %vm1078_vm10 }
  0x3d   : > { %5382 = vmatprep.subr.bf16.mxu0 %v5381_v5  ;;  %v6170_v1 = vpack.c.bf16 %v4584_v63, %v5809_v0 }
  0x3f   : > { %4540 = vmatmul.mubr.msk.f32.gmra.mrb[4].mxu0 %vm417_vm4, %v625_v6 }
  0x40   : > { %820 = vmatprep.mubr.f32.mxu0 %v5805_v7 }
  0x43   : > { %4551 = vmatmul.mubr.msk.f32.vlgmr.msra.gmra.mrb[0].mxu0 %vm417_vm4, %v739_v15 }
  0x44   : > { %826 = vmatprep.mubr.f32.mxu0 %v5805_v7  ;;  %5384 = vmatpush1.bf16.msra.mxu0 %v5383_v16 }
  0x45   : > { %5387 = vmatprep.subr.msk.bf16.mxu0 %vm5948_vm2, %v5385_v18 }
  0x47   : > { %4552 = vmatmul.mubr.msk.f32.gmra.mrb[2].mxu0 %vm417_vm4, %v741_v24 }
  0x48   : > { %832 = vmatprep.mubr.f32.mxu0 %v5805_v7  ;;  %5390 = vmatpush1.bf16.msk.msra.mxu0 %vm5948_vm2, %v5388_v26 }
  0x49   : > { %5451 = vmatprep.subr.bf16.mxu0 %v5808_v59 }
  0x4b   : > { %4553 = vmatmul.mubr.msk.f32.gmra.mrb[4].mxu0 %vm417_vm4, %v743_v27 }
  0x4c   : > { %937 = vmatprep.mubr.f32.mxu0 %v5805_v7 }
  0x4f   : > { %4564 = vmatmul.mubr.msk.f32.vlgmr.msra.gmra.mrb[0].mxu0 %vm417_vm4, %v856_v31 }
  0x50   : > { %943 = vmatprep.mubr.f32.mxu0 %v5805_v7 }
  0x53   : > { %4565 = vmatmul.mubr.msk.f32.gmra.mrb[2].mxu0 %vm417_vm4, %v858_v33 }
  0x54   : > { %949 = vmatprep.mubr.f32.mxu0 %v5805_v7 }
  0x57   : > { %4566 = vmatmul.mubr.msk.f32.gmra.mrb[4].mxu0 %vm417_vm4, %v860_v21 }
 0x122   : > { %v939_v39 = vpop.f32.mrb[0].mxu0 }
 0x123   : > { %v974_v40 = vadd.f32 %v967_v28, %v939_v39  ;;  %v941_v41 = vpop.f32.mrb[1].mxu0 }
 0x124   : > { %v975_v42 = vadd.f32 %v971_v38, %v941_v41  ;;  %v1054_v41 = vmul.u32 2, %v1050_v36 }
 0x125   : > { %v980_v43 = vmax.f32 %v974_v40, 0.0 }
 0x126   : > { %v981_v44 = vmax.f32 %v975_v42, 0.0  ;;  %v945_v45 = vpop.f32.mrb[2].mxu0  ;;  %v1061_v42 = vadd.s32 16, %v6146_v35  ;;  %vm1056_vm13 = vcmp.eq.s32.totalorder %v1052_v60, %v1054_v41  ;;  %v1070_v60 = vadd.s32 88, %v6146_v35  ;;  %v4618_v41 = vld [vmem:[%s7004_s3 + $0x28] sm:$0xf] }
 0x127   : > { %v976_v46 = vadd.f32 %v967_v28, %v945_v45  ;;  %v947_v47 = vpop.f32.mrb[3].mxu0  ;;  %v6188_v45 = vsel %vm1055_vm9, 1.0, %v5805_v7 }
 0x128   : > { %v977_v48 = vadd.f32 %v971_v38, %v947_v47  ;;  %v5727_v49 = vpack.i.bf16 %v981_v44, %v980_v43  ;;  %vm1080_vm15 = vcmp.eq.s32.totalorder %v1061_v42, %v6158_v61  ;;  %v1063_v47 = vadd.s32 32, %v6146_v35 }
 0x129   : > { %v982_v50 = vmax.f32 %v976_v46, 0.0 }
 0x12a   : > { %v983_v51 = vmax.f32 %v977_v48, 0.0  ;;  %5728 = vrot.lane.b32.xlu0 %v5727_v49, %s5807_s26  ;;  %v951_v52 = vpop.f32.mrb[4].mxu0  ;;  %v1064_v48 = vadd.s32 40, %v6146_v35  ;;  %v4568_v49 = vsel %vm1056_vm13, 1.0, %v5805_v7  ;;  %vm1082_vm9 = vcmp.eq.s32.totalorder %v1063_v47, %v6158_v61 }
 0x12b   : > { %v978_v53 = vadd.f32 %v967_v28, %v951_v52  ;;  %v953_v54 = vpop.f32.mrb[5].mxu0  ;;  %v1065_v52 = vadd.s32 48, %v6146_v35 }
 0x12c   : > { %v5732_v55 = vpack.i.bf16 %v983_v51, %v982_v50  ;;  %v979_v57 = vadd.f32 %v971_v38, %v953_v54  ;;  %vm1083_vm10 = vcmp.eq.s32.totalorder %v1064_v48, %v6158_v61  ;;  %v4625_v48 = vld [vmem:[%s7004_s3 + $0x40] sm:$0xff] }
 0x12d   : > { %v984_v56 = vmax.f32 %v978_v53, 0.0  ;;  %v1066_v53 = vadd.s32 56, %v6146_v35  ;;  %vm6221_vm11 = vmpackc.low %vm1083_vm10, %vm1082_vm9  ;;  %vm1084_vm13 = vcmp.eq.s32.totalorder %v1065_v52, %v6158_v61 }
 0x12e   : > { %5733 = vrot.lane.b32.xlu0 %v5732_v55, %s5807_s26  ;;  %v985_v58 = vmax.f32 %v979_v57, 0.0  ;;  %v1067_v55 = vadd.s32 64, %v6146_v35 }
 0x12f   : > { %1000 = vrot.lane.b32.xlu1 %v984_v56, %s5807_s26 }
 0x133   : > { %1002 = vrot.lane.b32.xlu1 %v985_v58, %s5807_s26 }
 0x19c   : > { %v5729_v2 = vpop.permute.xlu0 %5728 }
 0x19d   : > { %v5731_v3 = vunpack.i.h.bf16 %v5729_v2  ;;  %v5730_v4 = vunpack.i.l.bf16 %v5729_v2  ;;  %v1071_v2 = vadd.s32 96, %v6146_v35 }
 0x19f   : > { %v1005_v6 = vsel %vm7016_vm8, %v5730_v4, %v5731_v3  ;;  %v1015_v12 = vmax.f32 %v981_v44, %v5731_v3  ;;  %v1072_v3 = vadd.s32 104, %v6146_v35 }
 0x1a0   : > { %v5734_v5 = vpop.permute.xlu0 %5733  ;;  %v1014_v15 = vmax.f32 %v980_v43, %v1005_v6  ;;  %v1062_v43 = vadd.s32 24, %v6146_v35 }
 0x1a1   : > { %v5736_v8 = vunpack.i.h.bf16 %v5734_v5  ;;  %v5735_v9 = vunpack.i.l.bf16 %v5734_v5  ;;  %v1001_v11 = vpop.permute.xlu1 %1000  ;;  %v1029_v19 = vrot.slane %v1015_v12, 1  ;;  %v6264_v5 = vadd.s32 112, %v6146_v35 }
 0x1a2   : > { %v1026_v27 = vrot.slane %v1014_v15, 1  ;;  %vm1081_vm1 = vcmp.eq.s32.totalorder %v1062_v43, %v6158_v61  ;;  %v4621_v43 = vld [vmem:[%s7004_s3 + $0x30] sm:$0xff] }
 0x1a3   : > { %v1017_v13 = vmax.f32 %v983_v51, %v5736_v8  ;;  %v1006_v14 = vsel %vm7016_vm8, %v5735_v9, %v5736_v8  ;;  %vm6208_vm4 = vmpackc.low %vm1081_vm1, %vm1080_vm15  ;;  %vm1085_vm15 = vcmp.eq.s32.totalorder %v1066_v53, %v6158_v61  ;;  %vm1086_vm1 = vcmp.eq.s32.totalorder %v1067_v55, %v6158_v61  ;;  %v4629_v53 = vld [vmem:[%s7004_s3 + $0x50] sm:$0xff]  ;;  %v4630_v55 = vld [vmem:[%s7004_s3 + $0x58] sm:$0xf] }
 0x1a4   : > { %v1016_v16 = vmax.f32 %v982_v50, %v1006_v14  ;;  %v5810_v50 = vmov 1.0|1.0   ;;  %v1076_v8 = vadd.s32 136, %v6146_v35 }
 0x1a5   : > { %v1030_v17 = vrot.slane %v1017_v13, 1  ;;  %v1003_v18 = vpop.permute.xlu1 %1002 }
 0x1a6   : > { %v1007_v20 = vsel %vm7016_vm8, %v1001_v11, %v1003_v18  ;;  %v1019_v24 = vmax.f32 %v985_v58, %v1003_v18  ;;  %v1027_v25 = vrot.slane %v1016_v16, 1  ;;  %v1069_v58 = vadd.s32 80, %v6146_v35  ;;  %v4638_v18 = vld [vmem:[%s7004_s3 + $0x78] sm:$0xf] }
 0x1a7   : > { %v1018_v26 = vmax.f32 %v984_v56, %v1007_v20  ;;  %v1031_v30 = vsel %vm409_vm3, %v1029_v19, %v1030_v17  ;;  %v1068_v56 = vadd.s32 72, %v6146_v35 }
 0x1a8   : > { %v1034_v29 = vrot.slane %v1019_v24, 1  ;;  %v1028_v32 = vsel %vm409_vm3, %v1026_v27, %v1027_v25  ;;  %v1043_v21 = vmax.f32 %v1015_v12, %v1031_v30  ;;  %v1075_v12 = vadd.s32 128, %v6146_v35  ;;  %v4611_v35 = vld [vmem:[%s7004_s3 + $0x10] sm:$0xff] }
 0x1a9   : > { %v1032_v31 = vrot.slane %v1018_v26, 1  ;;  %v1042_v37 = vmax.f32 %v1014_v15, %v1028_v32  ;;  %vm1087_vm9 = vcmp.eq.s32.totalorder %v1068_v56, %v6158_v61  ;;  %v5444_v56 = vpack.c.bf16 %v4630_v55, %v4629_v53 }
 0x1aa   : > { %v1035_v33 = vsel %vm409_vm3, %v1030_v17, %v1034_v29  ;;  %v1047_v40 = vmax.f32 %v1019_v24, %v1034_v29  ;;  %vm6245_vm10 = vmpackc.low %vm1087_vm9, %vm1086_vm1  ;;  %vm1090_vm1 = vcmp.eq.s32.totalorder %v1071_v2, %v6158_v61  ;;  %vm1091_vm9 = vcmp.eq.s32.totalorder %v1072_v3, %v6158_v61  ;;  %v4637_v17 = vld [vmem:[%s7004_s3 + $0x70] sm:$0xff] }
 0x1ab   : > { %v1045_v22 = vmax.f32 %v1017_v13, %v1035_v33  ;;  %v1033_v23 = vsel %vm409_vm3, %v1027_v25, %v1032_v31  ;;  %v1046_v44 = vmax.f32 %v1018_v26, %v1032_v31  ;;  %vm6270_vm6 = vmpackc.low %vm1091_vm9, %vm1090_vm1  ;;  %vm1095_vm1 = vcmp.eq.s32.totalorder %v1076_v8, %v6158_v61  ;;  %v1307_v25 = vld [vmem:[%s7004_s3] sm:$0xff]  ;;  %v1308_v26 = vld [vmem:[%s7004_s3 + $0x8] sm:$0xf] }
 0x1ac   : > { %v1044_v28 = vmax.f32 %v1016_v16, %v1033_v23  ;;  %v4586_v9 = vsel %vm1095_vm1, 1.0, %v5805_v7  ;;  %vm1094_vm9 = vcmp.eq.s32.totalorder %v1075_v12, %v6158_v61  ;;  %v5452_v19 = vpack.c.bf16 %v4638_v18, %v4637_v17  ;;  %v4641_v8 = vld [vmem:[%s7004_s3 + $0x80] sm:$0xff]  ;;  %v4646_v12 = vld [vmem:[%s7004_s3 + $0x98] sm:$0xf] }
 0x1ad   : > { %v5391_v38 = vpack.c.bf16 %v1045_v22, %v1043_v21  ;;  %v5420_v11 = vpack.c.bf16 %v4586_v9, %v5809_v0  ;;  %vm5421_vm0 = vmpackc.low %vm409_vm3, %vm1094_vm9  ;;  %v4612_v0 = vld [vmem:[%s7004_s3 + $0x18] sm:$0xf]  ;;  %v5428_v36 = vpack.c.bf16 %v1308_v26, %v1307_v25  ;;  %vm7040_vm1 = vcmask 1043456   ;;  %v4642_v9 = vld [vmem:[%s7004_s3 + $0x88] sm:$0xf] }
 0x1ae   : > { %v5393_v39 = vpack.c.bf16 %v1044_v28, %v1042_v37  ;;  %v5424_v16 = vpack.c.bf16 %v4612_v0, %v4611_v35  ;;  %5454 = vmatpush3.bf16.msk.msra.mxu0 %vm5948_vm2, %v5452_v19  ;;  %vm7041_vm9 = vcmask 1044480   ;;  %v4653_v35 = vld [vmem:[%s7004_s3 + $0xb0] sm:$0xff]  ;;  %v4654_v0 = vld [vmem:[%s7004_s3 + $0xb8] sm:$0xf] }
 0x1af   : > { %5392 = vmatprep.subr.bf16.mxu1 %v5391_v38  ;;  %5459 = vmatprep.subr.bf16.mxu0 %v5808_v59  ;;  %v5468_v19 = vpack.c.bf16 %v4654_v0, %v4653_v35  ;;  %v4661_v25 = vld [vmem:[%s7004_s3 + $0xd0] sm:$0xff]  ;;  %v4662_v26 = vld [vmem:[%s7004_s3 + $0xd8] sm:$0xf] }
 0x1b0   : > { %5394 = vmatpush1.bf16.msra.mxu1 %v5393_v39  ;;  %v4702_v35 = vld [vmem:[%s7004_s3 + $0x178] sm:$0xf] }
 0x1b1   : > { %4587 = vmatprep.subr.msk.mxu1 %vm409_vm3, %v1047_v40  ;;  %v4617_v40 = vld [vmem:[%s7004_s3 + $0x20] sm:$0xff] }
 0x1b2   : > { %v5432_v42 = vpack.c.bf16 %v4618_v41, %v4617_v40  ;;  %v4678_v40 = vld [vmem:[%s7004_s3 + $0x118] sm:$0xf] }
 0x1b4   : > { %4588 = vmatpush1.msk.msra.mxu1 %vm409_vm3, %v1046_v44  ;;  %v4622_v44 = vld [vmem:[%s7004_s3 + $0x38] sm:$0xf] }
 0x1b5   : > { %4589 = vmatmul.mubr.msk.f32.vlgmr.msra.gmra.mrb[0].mxu1 %vm1132_vm12, %v6188_v45  ;;  %5395 = vmatprep.subr.bf16.mxu1 %v5808_v59  ;;  %v5436_v47 = vpack.c.bf16 %v4622_v44, %v4621_v43 }
 0x1b6   : > { %1215 = vmatprep.mubr.f32.mxu1 %v5805_v7  ;;  %5397 = vmatpush1.bf16.msk.msra.mxu1 %vm6190_vm14, %v5810_v50 }
 0x1b7   : > { %5398 = vmatprep.subr.bf16.mxu1 %v5808_v59 }
 0x1b9   : > { %4590 = vmatmul.mubr.msk.f32.gmra.mrb[2].mxu1 %vm1132_vm12, %v4568_v49  ;;  %vm6233_vm12 = vmpackc.low %vm1085_vm15, %vm1084_vm13  ;;  %vm1088_vm13 = vcmp.eq.s32.totalorder %v1069_v58, %v6158_v61  ;;  %vm1089_vm15 = vcmp.eq.s32.totalorder %v1070_v60, %v6158_v61  ;;  %v4626_v49 = vld [vmem:[%s7004_s3 + $0x48] sm:$0xf]  ;;  %v4633_v58 = vld [vmem:[%s7004_s3 + $0x60] sm:$0xff] }
 0x1ba   : > { %5400 = vmatpush1.bf16.msk.msra.mxu1 %vm6208_vm4, %v5810_v50  ;;  %vm6257_vm8 = vmpackc.low %vm1089_vm15, %vm1088_vm13  ;;  %vm1092_vm13 = vcmp.eq.s32.totalorder %v6264_v5, %v6158_v61  ;;  %v5440_v52 = vpack.c.bf16 %v4626_v49, %v4625_v48  ;;  %v4634_v60 = vld [vmem:[%s7004_s3 + $0x68] sm:$0xf]  ;;  %v4685_v49 = vld [vmem:[%s7004_s3 + $0x130] sm:$0xff] }
 0x1bb   : > { %5401 = vmatprep.subr.bf16.mxu1 %v5808_v59  ;;  %vm5417_vm15 = vmpackc.low %vm1093_vm7, %vm1092_vm13  ;;  %vm1222_vm7 = vcmask 121856   ;;  %v5448_v2 = vpack.c.bf16 %v4634_v60, %v4633_v58  ;;  %v4682_v48 = vld [vmem:[%s7004_s3 + $0x128] sm:$0xf]  ;;  %v4689_v60 = vld [vmem:[%s7004_s3 + $0x140] sm:$0xff] }
 0x1bc   : > { %v4749_v61 = vld [vmem:[%s7006_s5 + $0x40] sm:$0xff] }
 0x1be   : > { %5403 = vmatpush1.bf16.msk.msra.mxu1 %vm6221_vm11, %v5810_v50 }
 0x1bf   : > { %5404 = vmatprep.subr.bf16.mxu1 %v5808_v59 }
 0x1c2   : > { %5406 = vmatpush1.bf16.msk.msra.mxu1 %vm6233_vm12, %v5810_v50 }
 0x1c3   : > { %5407 = vmatprep.subr.bf16.mxu1 %v5808_v59 }
 0x1c6   : > { %5409 = vmatpush1.bf16.msk.msra.mxu1 %vm6245_vm10, %v5810_v50 }
 0x1c7   : > { %5410 = vmatprep.subr.bf16.mxu1 %v5808_v59 }
 0x1ca   : > { %5412 = vmatpush1.bf16.msk.msra.mxu1 %vm6257_vm8, %v5810_v50 }
 0x1cb   : > { %5413 = vmatprep.subr.bf16.mxu1 %v5808_v59 }
 0x1ce   : > { %5415 = vmatpush1.bf16.msk.msra.mxu1 %vm6270_vm6, %v5810_v50 }
 0x1cf   : > { %5416 = vmatprep.subr.bf16.mxu1 %v5808_v59 }
 0x1d2   : > { %5418 = vmatpush1.bf16.msk.msra.mxu1 %vm5417_vm15, %v5810_v50  ;;  %vm1317_vm15 = vcmask 97280  }
 0x1d3   : > { %5419 = vmatprep.subr.bf16.mxu1 %v5808_v59 }
 0x1d6   : > { %5422 = vmatpush1.bf16.msk.msra.mxu1 %vm5421_vm0, %v5420_v11  ;;  %vm5811_vm0 = vmmov 0   ;;  %v4645_v11 = vld [vmem:[%s7004_s3 + $0x90] sm:$0xff] }
 0x1d7   : > { %5423 = vmatprep.subr.bf16.mxu1 %v5808_v59  ;;  %5010 = vmatprep.mubr.msk.f32.mxu0 %vm5811_vm0, %v5805_v7 }
 0x288   : > { %v1211_v62 = vpop.f32.mrb[0].mxu1 }
 0x289   : > { %v1213_v13 = vpop.f32.mrb[1].mxu1 }
 0x28a   : > { %4609 = vmatprep.mubr.msk.f32.mxu1 %vm1222_vm7, %v1213_v13  ;;  %v5460_v13 = vpack.c.bf16 %v4646_v12, %v4645_v11 }
 0x28b   : > { %1297 = vmatmul.mubr.f32.vlgmr.msra.gmra.mrb[4].mxu1 %v1211_v62  ;;  %v5456_v62 = vpack.c.bf16 %v4642_v9, %v4641_v8  ;;  %v4694_v8 = vld [vmem:[%s7004_s3 + $0x158] sm:$0xf] }
 0x28c   : > { %v1217_v14 = vpop.f32.mrb[2].mxu1  ;;  %5426 = vmatpush3.bf16.msk.msra.mxu1 %vm5948_vm2, %v5424_v16 }
 0x28d   : > { %v1219_v15 = vpop.f32.mrb[3].mxu1  ;;  %5427 = vmatprep.subr.bf16.mxu1 %v5808_v59 }
 0x28e   : > { %4610 = vmatprep.mubr.msk.f32.mxu1 %vm1222_vm7, %v1219_v15  ;;  %v4650_v15 = vld [vmem:[%s7004_s3 + $0xa8] sm:$0xf] }
 0x28f   : > { %1302 = vmatmul.mubr.f32.gmra.mrb[6].mxu1 %v1217_v14  ;;  %v4649_v14 = vld [vmem:[%s7004_s3 + $0xa0] sm:$0xff] }
 0x290   : > { %4961 = vmatprep.mubr.msk.f32.mxu1 %vm5811_vm0, %v5805_v7  ;;  %v5464_v18 = vpack.c.bf16 %v4650_v15, %v4649_v14  ;;  %v4698_v14 = vld [vmem:[%s7004_s3 + $0x168] sm:$0xf]  ;;  %v4701_v15 = vld [vmem:[%s7004_s3 + $0x170] sm:$0xff] }
 0x35e   : > { %v6318_v20 = vpop.f32.mrb[4].mxu1 }
 0x35f   : > { %1717 = vrot.lane.b32.xlu0 %v6318_v20, %s5812_s25  ;;  %v1300_v24 = vpop.f32.mrb[5].mxu1  ;;  %v1471_v29 = vrot.slane %v6318_v20, 2  ;;  %v1314_v30 = vrot.slane %v6318_v20, 1  ;;  %v1635_v31 = vrot.slane %v6318_v20, 4  ;;  %v1553_v32 = vrot.slane %v6318_v20, 3 }
 0x360   : > { %v4658_v24 = vld [vmem:[%s7004_s3 + $0xc8] sm:$0xf] }
 0x362   : > { %v1303_v27 = vpop.f32.mrb[6].mxu1 }
 0x363   : > { %v1315_v33 = vrot.slane %v1303_v27, 1  ;;  %v1472_v34 = vrot.slane %v1303_v27, 2  ;;  %v1554_v21 = vrot.slane %v1303_v27, 3  ;;  %v1636_v22 = vrot.slane %v1303_v27, 4  ;;  %v1305_v23 = vpop.f32.mrb[7].mxu1 }
 0x365   : > { %v1473_v37 = vsel %vm618_vm5, %v1471_v29, %v1472_v34  ;;  %v1316_v28 = vsel %vm409_vm3, %v1314_v30, %v1315_v33  ;;  %v1637_v38 = vsel %vm7040_vm1, %v1635_v31, %v1636_v22  ;;  %v1555_v39 = vsel %vm7041_vm9, %v1553_v32, %v1554_v21  ;;  %v4665_v32 = vld [vmem:[%s7004_s3 + $0xe0] sm:$0xff]  ;;  %v4666_v33 = vld [vmem:[%s7004_s3 + $0xe8] sm:$0xf]  ;;  %v4669_v34 = vld [vmem:[%s7004_s3 + $0xf0] sm:$0xff] }
 0x366   : > { %1879 = vrot.lane.b32.xlu0 %v1473_v37, %s5812_s25  ;;  %1798 = vrot.lane.b32.xlu1 %v1316_v28, %s5812_s25  ;;  %v5476_v31 = vpack.c.bf16 %v4662_v26, %v4661_v25  ;;  %v4670_v21 = vld [vmem:[%s7004_s3 + $0xf8] sm:$0xf]  ;;  %vm3757_vm5 = vcmask 56320  }
 0x367   : > { %4962 = vmatmul.mubr.msk.f32.vlgmr.msra.gmra.mrb[8].mxu1 %vm1317_vm15, %v1316_v28  ;;  %v4710_v25 = vld [vmem:[%s7004_s3 + $0x198] sm:$0xf] }
 0x368   : > { %5430 = vmatpush3.bf16.msk.msra.mxu1 %vm5948_vm2, %v5428_v36  ;;  %4968 = vmatprep.mubr.msk.f32.mxu1 %vm5811_vm0, %v5805_v7  ;;  %v5480_v36 = vpack.c.bf16 %v4666_v33, %v4665_v32  ;;  %v4714_v32 = vld [vmem:[%s7004_s3 + $0x1a8] sm:$0xf]  ;;  %v4717_v33 = vld [vmem:[%s7004_s3 + $0x1b0] sm:$0xff] }
 0x369   : > { %5431 = vmatprep.subr.bf16.mxu1 %v5808_v59 }
 0x36a   : > { %2041 = vrot.lane.b32.xlu0 %v1637_v38, %s5812_s25  ;;  %1960 = vrot.lane.b32.xlu1 %v1555_v39, %s5812_s25  ;;  %s5813_s25 = smov 104  }
 0x36b   : > { %4969 = vmatmul.mubr.msk.f32.vlgmr.msra.gmra.mrb[10].mxu1 %vm1317_vm15, %v6318_v20 }
 0x36c   : > { %5434 = vmatpush3.bf16.msk.msra.mxu1 %vm5948_vm2, %v5432_v42  ;;  %4975 = vmatprep.mubr.msk.f32.mxu1 %vm5811_vm0, %v5805_v7 }
 0x36d   : > { %5435 = vmatprep.subr.bf16.mxu1 %v5808_v59 }
 0x36e   : > { %2203 = vrot.lane.b32.xlu0 %v1316_v28, %s5813_s25  ;;  %2122 = vrot.lane.b32.xlu1 %v6318_v20, %s5813_s25 }
 0x36f   : > { %4976 = vmatmul.mubr.msk.f32.vlgmr.msra.gmra.mrb[12].mxu1 %vm1317_vm15, %v1473_v37 }
 0x370   : > { %5438 = vmatpush3.bf16.msk.msra.mxu1 %vm5948_vm2, %v5436_v47  ;;  %4982 = vmatprep.mubr.msk.f32.mxu1 %vm5811_vm0, %v5805_v7  ;;  %v4681_v47 = vld [vmem:[%s7004_s3 + $0x120] sm:$0xff] }
 0x371   : > { %5439 = vmatprep.subr.bf16.mxu1 %v5808_v59 }
 0x372   : > { %2365 = vrot.lane.b32.xlu0 %v1555_v39, %s5813_s25  ;;  %2284 = vrot.lane.b32.xlu1 %v1473_v37, %s5813_s25 }
 0x373   : > { %4983 = vmatmul.mubr.msk.f32.vlgmr.msra.gmra.mrb[14].mxu1 %vm1317_vm15, %v1555_v39 }
 0x374   : > { %5442 = vmatpush3.bf16.msk.msra.mxu1 %vm5948_vm2, %v5440_v52  ;;  %4989 = vmatprep.mubr.msk.f32.mxu1 %vm5811_vm0, %v5805_v7  ;;  %v4686_v52 = vld [vmem:[%s7004_s3 + $0x138] sm:$0xf] }
 0x375   : > { %5443 = vmatprep.subr.bf16.mxu1 %v5808_v59  ;;  %v5500_v58 = vpack.c.bf16 %v4686_v52, %v4685_v49 }
 0x376   : > { %2527 = vrot.lane.b32.xlu0 %v6318_v20, %s5814_s22  ;;  %2446 = vrot.lane.b32.xlu1 %v1637_v38, %s5813_s25  ;;  %s378_s25 = scalar_lea.vmem [#allocation2], %s377_s16 }
 0x377   : > { %4990 = vmatmul.mubr.msk.f32.vlgmr.msra.gmra.mrb[16].mxu1 %vm1317_vm15, %v1637_v38  ;;  %s4449_s12 = sshll.u32 %s378_s25, 4  ;;  %s6960_s12 = int_to_ptr.vmem [resolvable:$true] %s4449_s12 }
 0x378   : > { %5446 = vmatpush3.bf16.msk.msra.mxu1 %vm5948_vm2, %v5444_v56  ;;  %4996 = vmatprep.mubr.msk.f32.mxu1 %vm5811_vm0, %v5805_v7  ;;  %v5496_v56 = vpack.c.bf16 %v4682_v48, %v4681_v47 }
 0x379   : > { %5447 = vmatprep.subr.bf16.mxu1 %v5808_v59 }
 0x37a   : > { %2689 = vrot.lane.b32.xlu0 %v1473_v37, %s5814_s22  ;;  %2608 = vrot.lane.b32.xlu1 %v1316_v28, %s5814_s22 }
 0x37e   : > { %2851 = vrot.lane.b32.xlu0 %v1637_v38, %s5814_s22  ;;  %2770 = vrot.lane.b32.xlu1 %v1555_v39, %s5814_s22  ;;  %s4437_s22 = scalar_lea.sflag [#allocation3], %s377_s16 }
 0x382   : > { %3013 = vrot.lane.b32.xlu0 %v1316_v28, %s5815_s24  ;;  %2932 = vrot.lane.b32.xlu1 %v6318_v20, %s5815_s24 }
 0x386   : > { %3175 = vrot.lane.b32.xlu0 %v1555_v39, %s5815_s24  ;;  %3094 = vrot.lane.b32.xlu1 %v1473_v37, %s5815_s24 }
 0x38a   : > { %3337 = vrot.lane.b32.xlu0 %v6318_v20, %s5816_s29  ;;  %3256 = vrot.lane.b32.xlu1 %v1637_v38, %s5815_s24  ;;  %v4657_v20 = vld [vmem:[%s7004_s3 + $0xc0] sm:$0xff]  ;;  %s5741_s24 = scalar_lea.vmem %s6960_s12, 16 }
 0x38b   : > { %v5472_v30 = vpack.c.bf16 %v4658_v24, %v4657_v20  ;;  %v4706_v20 = vld [vmem:[%s7004_s3 + $0x188] sm:$0xf]  ;;  %v4709_v24 = vld [vmem:[%s7004_s3 + $0x190] sm:$0xff]  ;;  %p5742_p11 = scmp.ne.s32.totalorder %s6960_s12, %s5741_s24 }
 0x38d   : > { %p5743_p12 = pnand %p5742_p11, %p5916_p5 }
 0x38e   : > { %3499 = vrot.lane.b32.xlu0 %v1473_v37, %s5816_s29  ;;  %3418 = vrot.lane.b32.xlu1 %v1316_v28, %s5816_s29  ;;  %v5484_v37 = vpack.c.bf16 %v4670_v21, %v4669_v34  ;;  %v4673_v28 = vld [vmem:[%s7004_s3 + $0x100] sm:$0xff]  ;;  %v4718_v34 = vld [vmem:[%s7004_s3 + $0x1b8] sm:$0xf] }
 0x38f   : > { %p5744_p13 = pneg %p5743_p12 }
 0x392   : > { %3661 = vrot.lane.b32.xlu0 %v1637_v38, %s5816_s29  ;;  %3580 = vrot.lane.b32.xlu1 %v1555_v39, %s5816_s29  ;;  %v4674_v38 = vld [vmem:[%s7004_s3 + $0x108] sm:$0xf]  ;;  %v4677_v39 = vld [vmem:[%s7004_s3 + $0x110] sm:$0xff]  ;;  %s5745_s29 = sshll.u32 %s5817_s21, 4  ;;  %s5746_s29 = int_to_ptr.vmem [resolvable:$false] %s5745_s29 }
 0x393   : > { %v5488_v43 = vpack.c.bf16 %v4674_v38, %v4673_v28  ;;  %v5492_v44 = vpack.c.bf16 %v4678_v40, %v4677_v39  ;;  %v4722_v28 = vld [vmem:[%s7004_s3 + $0x1c8] sm:$0xf]  ;;  %v4725_v38 = vld [vmem:[%s7004_s3 + $0x1d0] sm:$0xff]  ;;  %v4726_v39 = vld [vmem:[%s7004_s3 + $0x1d8] sm:$0xf]  ;;  %s5747_s19 = scalar_lea.vmem %s5746_s29, 32  ;;  %p5748_p0 = scmp.lt.s32.totalorder %s6960_s12, %s5746_s29 }
 0x394   : > { %p5749_p1 = scmp.lt.s32.totalorder %s5747_s19, %s5741_s24 }
 0x396   : > { %p5750_p2 = por %p5749_p1, %p5748_p0 }
 0x398   : > { %p5751_p3 = pnand %p5750_p2, %p5744_p13 }
 0x3d1   : > { %v1718_v3 = vpop.permute.xlu0 %1717 }
 0x3d2   : > { %4997 = vmatmul.mubr.msk.f32.vlgmr.msra.gmra.mrb[18].mxu1 %vm1317_vm15, %v1718_v3  ;;  %v4693_v3 = vld [vmem:[%s7004_s3 + $0x150] sm:$0xff] }
 0x3d3   : > { %5450 = vmatpush3.bf16.msk.msra.mxu1 %vm5948_vm2, %v5448_v2  ;;  %5003 = vmatprep.mubr.msk.f32.mxu1 %vm5811_vm0, %v5805_v7  ;;  %v4690_v2 = vld [vmem:[%s7004_s3 + $0x148] sm:$0xf] }
 0x3d4   : > { %5455 = vmatprep.subr.bf16.mxu1 %v5808_v59  ;;  %v5504_v12 = vpack.c.bf16 %v4690_v2, %v4689_v60 }
 0x3d8   : > { %v1880_v16 = vpop.permute.xlu0 %1879  ;;  %v1799_v17 = vpop.permute.xlu1 %1798 }
 0x3d9   : > { %5004 = vmatmul.mubr.msk.f32.vlgmr.msra.gmra.mrb[20].mxu1 %vm1317_vm15, %v1799_v17  ;;  %5011 = vmatmul.mubr.msk.f32.vlgmr.msra.gmra.mrb[6].mxu0 %vm1317_vm15, %v1880_v16 }
 0x3da   : > { %5458 = vmatpush3.bf16.msk.msra.mxu1 %vm5948_vm2, %v5456_v62  ;;  %5462 = vmatpush3.bf16.msk.msra.mxu0 %vm5948_vm2, %v5460_v13  ;;  %v5508_v62 = vpack.c.bf16 %v4694_v8, %v4693_v3  ;;  %v4697_v13 = vld [vmem:[%s7004_s3 + $0x160] sm:$0xff] }
 0x3db   : > { %5024 = vmatprep.mubr.msk.f32.mxu0 %vm5811_vm0, %v5805_v7  ;;  %5017 = vmatprep.mubr.msk.f32.mxu1 %vm5811_vm0, %v5805_v7  ;;  %v5512_v17 = vpack.c.bf16 %v4698_v14, %v4697_v13 }
 0x3dc   : > { %v2042_v27 = vpop.permute.xlu0 %2041  ;;  %v1961_v29 = vpop.permute.xlu1 %1960  ;;  %5463 = vmatprep.subr.bf16.mxu1 %v5808_v59  ;;  %5467 = vmatprep.subr.bf16.mxu0 %v5808_v59 }
 0x3dd   : > { %5018 = vmatmul.mubr.msk.f32.vlgmr.msra.gmra.mrb[22].mxu1 %vm1317_vm15, %v1961_v29  ;;  %5025 = vmatmul.mubr.msk.f32.vlgmr.msra.gmra.mrb[8].mxu0 %vm1317_vm15, %v2042_v27 }
 0x3de   : > { %5466 = vmatpush3.bf16.msk.msra.mxu1 %vm5948_vm2, %v5464_v18  ;;  %5470 = vmatpush3.bf16.msk.msra.mxu0 %vm5948_vm2, %v5468_v19  ;;  %v5516_v18 = vpack.c.bf16 %v4702_v35, %v4701_v15  ;;  %v4705_v19 = vld [vmem:[%s7004_s3 + $0x180] sm:$0xff] }
 0x3df   : > { %5038 = vmatprep.mubr.msk.f32.mxu0 %vm5811_vm0, %v5805_v7  ;;  %5031 = vmatprep.mubr.msk.f32.mxu1 %vm5811_vm0, %v5805_v7  ;;  %v5520_v29 = vpack.c.bf16 %v4706_v20, %v4705_v19 }
 0x3e0   : > { %v2204_v22 = vpop.permute.xlu0 %2203  ;;  %v2123_v23 = vpop.permute.xlu1 %2122  ;;  %5471 = vmatprep.subr.bf16.mxu1 %v5808_v59  ;;  %5475 = vmatprep.subr.bf16.mxu0 %v5808_v59 }
 0x3e1   : > { %5032 = vmatmul.mubr.msk.f32.vlgmr.msra.gmra.mrb[24].mxu1 %vm1317_vm15, %v2123_v23  ;;  %5039 = vmatmul.mubr.msk.f32.vlgmr.msra.gmra.mrb[10].mxu0 %vm1317_vm15, %v2204_v22 }
 0x3e2   : > { %5474 = vmatpush3.bf16.msk.msra.mxu1 %vm5948_vm2, %v5472_v30  ;;  %5478 = vmatpush3.bf16.msk.msra.mxu0 %vm5948_vm2, %v5476_v31  ;;  %v5524_v30 = vpack.c.bf16 %v4710_v25, %v4709_v24  ;;  %v4713_v31 = vld [vmem:[%s7004_s3 + $0x1a0] sm:$0xff] }
 0x3e3   : > { %5052 = vmatprep.mubr.msk.f32.mxu0 %vm5811_vm0, %v5805_v7  ;;  %5045 = vmatprep.mubr.msk.f32.mxu1 %vm5811_vm0, %v5805_v7  ;;  %v5528_v23 = vpack.c.bf16 %v4714_v32, %v4713_v31 }
 0x3e4   : > { %v2366_v41 = vpop.permute.xlu0 %2365  ;;  %v2285_v42 = vpop.permute.xlu1 %2284  ;;  %5479 = vmatprep.subr.bf16.mxu1 %v5808_v59  ;;  %5483 = vmatprep.subr.bf16.mxu0 %v5808_v59 }
 0x3e5   : > { %5046 = vmatmul.mubr.msk.f32.vlgmr.msra.gmra.mrb[26].mxu1 %vm1317_vm15, %v2285_v42  ;;  %5053 = vmatmul.mubr.msk.f32.vlgmr.msra.gmra.mrb[12].mxu0 %vm1317_vm15, %v2366_v41 }
 0x3e6   : > { %5482 = vmatpush3.bf16.msk.msra.mxu1 %vm5948_vm2, %v5480_v36  ;;  %5486 = vmatpush3.bf16.msk.msra.mxu0 %vm5948_vm2, %v5484_v37  ;;  %v5532_v36 = vpack.c.bf16 %v4718_v34, %v4717_v33  ;;  %v4721_v37 = vld [vmem:[%s7004_s3 + $0x1c0] sm:$0xff] }
 0x3e7   : > { %5066 = vmatprep.mubr.msk.f32.mxu0 %vm5811_vm0, %v5805_v7  ;;  %5059 = vmatprep.mubr.msk.f32.mxu1 %vm5811_vm0, %v5805_v7  ;;  %v5536_v42 = vpack.c.bf16 %v4722_v28, %v4721_v37 }
 0x3e8   : > { %v2528_v53 = vpop.permute.xlu0 %2527  ;;  %v2447_v55 = vpop.permute.xlu1 %2446  ;;  %5487 = vmatprep.subr.bf16.mxu1 %v5808_v59  ;;  %5491 = vmatprep.subr.bf16.mxu0 %v5808_v59 }
 0x3e9   : > { %5060 = vmatmul.mubr.msk.f32.vlgmr.msra.gmra.mrb[28].mxu1 %vm1317_vm15, %v2447_v55  ;;  %5067 = vmatmul.mubr.msk.f32.vlgmr.msra.gmra.mrb[14].mxu0 %vm1317_vm15, %v2528_v53 }
 0x3ea   : > { %5490 = vmatpush3.bf16.msk.msra.mxu1 %vm5948_vm2, %v5488_v43  ;;  %5494 = vmatpush3.bf16.msk.msra.mxu0 %vm5948_vm2, %v5492_v44  ;;  %v5540_v43 = vpack.c.bf16 %v4726_v39, %v4725_v38 }
 0x3eb   : > { %5080 = vmatprep.mubr.msk.f32.mxu0 %vm5811_vm0, %v5805_v7  ;;  %5073 = vmatprep.mubr.msk.f32.mxu1 %vm5811_vm0, %v5805_v7 }
 0x3ec   : > { %v2690_v9 = vpop.permute.xlu0 %2689  ;;  %v2609_v11 = vpop.permute.xlu1 %2608  ;;  %5495 = vmatprep.subr.bf16.mxu1 %v5808_v59  ;;  %5499 = vmatprep.subr.bf16.mxu0 %v5808_v59 }
 0x3ed   : > { %5074 = vmatmul.mubr.msk.f32.vlgmr.msra.gmra.mrb[30].mxu1 %vm1317_vm15, %v2609_v11  ;;  %5081 = vmatmul.mubr.msk.f32.vlgmr.msra.gmra.mrb[16].mxu0 %vm1317_vm15, %v2690_v9 }
 0x3ee   : > { %5498 = vmatpush3.bf16.msk.msra.mxu1 %vm5948_vm2, %v5496_v56  ;;  %5502 = vmatpush3.bf16.msk.msra.mxu0 %vm5948_vm2, %v5500_v58 }
 0x3ef   : > { %5094 = vmatprep.mubr.msk.f32.mxu0 %vm5811_vm0, %v5805_v7  ;;  %5087 = vmatprep.mubr.msk.f32.mxu1 %vm5811_vm0, %v5805_v7 }
 0x3f0   : > { %v2852_v0 = vpop.permute.xlu0 %2851  ;;  %v2771_v16 = vpop.permute.xlu1 %2770  ;;  %5503 = vmatprep.subr.bf16.mxu1 %v5808_v59  ;;  %5507 = vmatprep.subr.bf16.mxu0 %v5808_v59 }
 0x3f1   : > { %5088 = vmatmul.mubr.msk.f32.vlgmr.msra.gmra.mrb[32].mxu1 %vm1317_vm15, %v2771_v16  ;;  %5095 = vmatmul.mubr.msk.f32.vlgmr.msra.gmra.mrb[18].mxu0 %vm1317_vm15, %v2852_v0 }
 0x3f2   : > { %5506 = vmatpush3.bf16.msk.msra.mxu1 %vm5948_vm2, %v5504_v12  ;;  %5510 = vmatpush3.bf16.msk.msra.mxu0 %vm5948_vm2, %v5508_v62 }
 0x3f3   : > { %5108 = vmatprep.mubr.msk.f32.mxu0 %vm5811_vm0, %v5805_v7  ;;  %5101 = vmatprep.mubr.msk.f32.mxu1 %vm5811_vm0, %v5805_v7 }
 0x3f4   : > { %v3014_v26 = vpop.permute.xlu0 %3013  ;;  %v2933_v27 = vpop.permute.xlu1 %2932  ;;  %5511 = vmatprep.subr.bf16.mxu1 %v5808_v59  ;;  %5515 = vmatprep.subr.bf16.mxu0 %v5808_v59 }
 0x3f5   : > { %5102 = vmatmul.mubr.msk.f32.vlgmr.msra.gmra.mrb[34].mxu1 %vm1317_vm15, %v2933_v27  ;;  %5109 = vmatmul.mubr.msk.f32.vlgmr.msra.gmra.mrb[20].mxu0 %vm1317_vm15, %v3014_v26 }
 0x3f6   : > { %5514 = vmatpush3.bf16.msk.msra.mxu1 %vm5948_vm2, %v5512_v17  ;;  %5518 = vmatpush3.bf16.msk.msra.mxu0 %vm5948_vm2, %v5516_v18 }
 0x3f7   : > { %5122 = vmatprep.mubr.msk.f32.mxu0 %vm5811_vm0, %v5805_v7  ;;  %5115 = vmatprep.mubr.msk.f32.mxu1 %vm5811_vm0, %v5805_v7 }
 0x3f8   : > { %v3176_v21 = vpop.permute.xlu0 %3175  ;;  %v3095_v22 = vpop.permute.xlu1 %3094  ;;  %5519 = vmatprep.subr.bf16.mxu1 %v5808_v59  ;;  %5523 = vmatprep.subr.bf16.mxu0 %v5808_v59 }
 0x3f9   : > { %5116 = vmatmul.mubr.msk.f32.vlgmr.msra.gmra.mrb[36].mxu1 %vm1317_vm15, %v3095_v22  ;;  %5123 = vmatmul.mubr.msk.f32.vlgmr.msra.gmra.mrb[22].mxu0 %vm1317_vm15, %v3176_v21 }
 0x3fa   : > { %5522 = vmatpush3.bf16.msk.msra.mxu1 %vm5948_vm2, %v5520_v29  ;;  %5526 = vmatpush3.bf16.msk.msra.mxu0 %vm5948_vm2, %v5524_v30 }
 0x3fb   : > { %5136 = vmatprep.mubr.msk.f32.mxu0 %vm5811_vm0, %v5805_v7  ;;  %5129 = vmatprep.mubr.msk.f32.mxu1 %vm5811_vm0, %v5805_v7 }
 0x3fc   : > { %v3338_v40 = vpop.permute.xlu0 %3337  ;;  %v3257_v41 = vpop.permute.xlu1 %3256  ;;  %5527 = vmatprep.subr.bf16.mxu1 %v5808_v59  ;;  %5531 = vmatprep.subr.bf16.mxu0 %v5808_v59 }
 0x3fd   : > { %5130 = vmatmul.mubr.msk.f32.vlgmr.msra.gmra.mrb[38].mxu1 %vm1317_vm15, %v3257_v41  ;;  %5137 = vmatmul.mubr.msk.f32.vlgmr.msra.gmra.mrb[24].mxu0 %vm1317_vm15, %v3338_v40 }
 0x3fe   : > { %5530 = vmatpush3.bf16.msk.msra.mxu1 %vm5948_vm2, %v5528_v23  ;;  %5534 = vmatpush3.bf16.msk.msra.mxu0 %vm5948_vm2, %v5532_v36 }
 0x3ff   : > { %5150 = vmatprep.mubr.msk.f32.mxu0 %vm5811_vm0, %v5805_v7  ;;  %5143 = vmatprep.mubr.msk.f32.mxu1 %vm5811_vm0, %v5805_v7 }
 0x400   : > { %v3500_v44 = vpop.permute.xlu0 %3499  ;;  %v3419_v47 = vpop.permute.xlu1 %3418  ;;  %5535 = vmatprep.subr.bf16.mxu1 %v5808_v59  ;;  %5539 = vmatprep.subr.bf16.mxu0 %v5808_v59 }
 0x401   : > { %5144 = vmatmul.mubr.msk.f32.vlgmr.msra.gmra.mrb[40].mxu1 %vm1317_vm15, %v3419_v47  ;;  %5151 = vmatmul.mubr.msk.f32.vlgmr.msra.gmra.mrb[26].mxu0 %vm1317_vm15, %v3500_v44 }
 0x402   : > { %5538 = vmatpush3.bf16.msk.msra.mxu1 %vm5948_vm2, %v5536_v42  ;;  %5542 = vmatpush3.bf16.msk.msra.mxu0 %vm5948_vm2, %v5540_v43  ;;  %vm5566_vm2 = vmpackc.low %vm409_vm3, %vm1092_vm13 }
 0x403   : > { %5164 = vmatprep.mubr.msk.f32.mxu0 %vm5811_vm0, %v5805_v7  ;;  %5157 = vmatprep.mubr.msk.f32.mxu1 %vm5811_vm0, %v5805_v7 }
 0x404   : > { %v3662_v48 = vpop.permute.xlu0 %3661  ;;  %v3581_v49 = vpop.permute.xlu1 %3580  ;;  %5167 = vmatprep.subr.mxu1 %v5805_v7  ;;  %5543 = vmatprep.subr.bf16.mxu0 %v5808_v59 }
 0x405   : > { %5158 = vmatmul.mubr.msk.f32.vlgmr.msra.gmra.mrb[42].mxu1 %vm1317_vm15, %v3581_v49  ;;  %5165 = vmatmul.mubr.msk.f32.vlgmr.msra.gmra.mrb[28].mxu0 %vm1317_vm15, %v3662_v48 }
 0x406   : > { %5169 = vmatprep.mubr.msk.f32.mxu1 %vm5811_vm0, %v5805_v7  ;;  %5545 = vmatpush3.bf16.msk.msra.mxu0 %vm6190_vm14, %v5810_v50  ;;  %vm7043_vm14 = vmmov %vm7040_vm1 }
 0x407   : > { %5546 = vmatprep.subr.bf16.mxu0 %v5808_v59  ;;  %5204 = vmatprep.mubr.msk.f32.mxu0 %vm5811_vm0, %v5805_v7 }
 0x40a   : > { %5548 = vmatpush3.bf16.msk.msra.mxu0 %vm6208_vm4, %v5810_v50  ;;  %vm4345_vm4 = vcmask 687104  }
 0x40b   : > { %5549 = vmatprep.subr.bf16.mxu0 %v5808_v59 }
 0x40e   : > { %5551 = vmatpush3.bf16.msk.msra.mxu0 %vm6221_vm11, %v5810_v50  ;;  %vm4422_vm11 = vcmask 73728  }
 0x40f   : > { %5552 = vmatprep.subr.bf16.mxu0 %v5808_v59 }
 0x412   : > { %5554 = vmatpush3.bf16.msk.msra.mxu0 %vm6233_vm12, %v5810_v50 }
 0x413   : > { %5555 = vmatprep.subr.bf16.mxu0 %v5808_v59 }
 0x416   : > { %5557 = vmatpush3.bf16.msk.msra.mxu0 %vm6245_vm10, %v5810_v50 }
 0x417   : > { %5558 = vmatprep.subr.bf16.mxu0 %v5808_v59 }
 0x41a   : > { %5560 = vmatpush3.bf16.msk.msra.mxu0 %vm6257_vm8, %v5810_v50  ;;  %vm4258_vm8 = vcmask 982016  }
 0x41b   : > { %5561 = vmatprep.subr.bf16.mxu0 %v5808_v59 }
 0x41e   : > { %5563 = vmatpush3.bf16.msk.msra.mxu0 %vm6270_vm6, %v5810_v50  ;;  %vm3928_vm6 = vcmask 523264  }
 0x41f   : > { %5564 = vmatprep.subr.bf16.mxu0 %v5808_v59 }
 0x422   : > { %5567 = vmatpush3.bf16.msk.msra.mxu0 %vm5566_vm2, %v6170_v1  ;;  %v4750_v1 = vld [vmem:[%s7006_s5 + $0x48] sm:$0xff] }
 0x423   : > { %5592 = vmatprep.subr.bf16.mxu0 %v5808_v59  ;;  %v5569_v5 = vpack.c.bf16 %v4750_v1, %v4749_v61  ;;  %v4247_v61 = vld [vmem:[%s7008_s7 + $0x28] sm:$0xff] }
 0x43a   : > { %v1389_v10 = vpop.f32.mrb[8].mxu1 }
 0x43b   : > { %v4963_v46 = vpop.f32.mrb[9].mxu1 }
 0x43e   : > { %v1464_v51 = vpop.f32.mrb[10].mxu1 }
 0x43f   : > { %v1465_v54 = vadd.f32 %v1464_v51, %v1389_v10  ;;  %v4970_v57 = vpop.f32.mrb[11].mxu1 }
 0x442   : > { %v1545_v63 = vpop.f32.mrb[12].mxu1 }
 0x443   : > { %v1549_v52 = vadd.f32 %v1545_v63, %v1465_v54  ;;  %v4977_v53 = vpop.f32.mrb[13].mxu1 }
 0x446   : > { %v1627_v55 = vpop.f32.mrb[14].mxu1 }
 0x447   : > { %v1631_v56 = vadd.f32 %v1627_v55, %v1549_v52  ;;  %v4984_v4 = vpop.f32.mrb[15].mxu1 }
 0x44a   : > { %v1709_v58 = vpop.f32.mrb[16].mxu1 }
 0x44b   : > { %v1713_v60 = vadd.f32 %v1709_v58, %v1631_v56  ;;  %v4991_v2 = vpop.f32.mrb[17].mxu1 }
 0x4a5   : > { %v1790_v3 = vpop.f32.mrb[18].mxu1 }
 0x4a6   : > { %v1794_v8 = vadd.f32 %v1790_v3, %v1713_v60  ;;  %v4998_v6 = vpop.f32.mrb[19].mxu1 }
 0x4ac   : > { %v1871_v50 = vpop.f32.mrb[20].mxu1  ;;  %v1952_v9 = vpop.f32.mrb[6].mxu0 }
 0x4ad   : > { %v1875_v11 = vadd.f32 %v1871_v50, %v1794_v8  ;;  %v5005_v12 = vpop.f32.mrb[21].mxu1  ;;  %v5012_v62 = vpop.f32.mrb[7].mxu0 }
 0x4af   : > { %v1956_v13 = vadd.f32 %v1952_v9, %v1875_v11 }
 0x4b0   : > { %v2033_v14 = vpop.f32.mrb[22].mxu1  ;;  %v2114_v15 = vpop.f32.mrb[8].mxu0 }
 0x4b1   : > { %v2037_v35 = vadd.f32 %v2033_v14, %v1956_v13  ;;  %v5019_v0 = vpop.f32.mrb[23].mxu1  ;;  %v5026_v16 = vpop.f32.mrb[9].mxu0 }
 0x4b3   : > { %v2118_v17 = vadd.f32 %v2114_v15, %v2037_v35 }
 0x4b4   : > { %v2195_v18 = vpop.f32.mrb[24].mxu1  ;;  %v2276_v19 = vpop.f32.mrb[10].mxu0 }
 0x4b5   : > { %v2199_v20 = vadd.f32 %v2195_v18, %v2118_v17  ;;  %v5033_v24 = vpop.f32.mrb[25].mxu1  ;;  %v5040_v25 = vpop.f32.mrb[11].mxu0 }
 0x4b7   : > { %v2280_v26 = vadd.f32 %v2276_v19, %v2199_v20  ;;  %v4729_v19 = vld [vmem:[%s7005_s4] ss:$0 sm:$0xff] }
 0x4b8   : > { %v2357_v27 = vpop.f32.mrb[26].mxu1  ;;  %v2438_v29 = vpop.f32.mrb[12].mxu0 }
 0x4b9   : > { %v2361_v30 = vadd.f32 %v2357_v27, %v2280_v26  ;;  %v5047_v31 = vpop.f32.mrb[27].mxu1  ;;  %v5054_v32 = vpop.f32.mrb[13].mxu0 }
 0x4ba   : > { %v4751_v31 = vld [vmem:[%s7006_s5 + $0x50] sm:$0xff] }
 0x4bb   : > { %v2442_v33 = vadd.f32 %v2438_v29, %v2361_v30 }
 0x4bc   : > { %v2519_v34 = vpop.f32.mrb[28].mxu1  ;;  %v2600_v21 = vpop.f32.mrb[14].mxu0 }
 0x4bd   : > { %v2523_v22 = vadd.f32 %v2519_v34, %v2442_v33  ;;  %v5061_v23 = vpop.f32.mrb[29].mxu1  ;;  %v5068_v36 = vpop.f32.mrb[15].mxu0  ;;  %v4753_v33 = vld [vmem:[%s7006_s5 + $0x60] sm:$0xff]  ;;  %v4754_v34 = vld [vmem:[%s7006_s5 + $0x68] sm:$0xff] }
 0x4be   : > { %v4756_v23 = vld [vmem:[%s7006_s5 + $0x78] sm:$0xff] }
 0x4bf   : > { %v2604_v37 = vadd.f32 %v2600_v21, %v2523_v22  ;;  %v5575_v21 = vpack.c.bf16 %v4754_v34, %v4753_v33  ;;  %v4755_v22 = vld [vmem:[%s7006_s5 + $0x70] sm:$0xff]  ;;  %v4251_v33 = vld [vmem:[%s7008_s7 + $0x48] sm:$0xff] }
 0x4c0   : > { %v2681_v28 = vpop.f32.mrb[30].mxu1  ;;  %v2762_v38 = vpop.f32.mrb[16].mxu0  ;;  %v5578_v36 = vpack.c.bf16 %v4756_v23, %v4755_v22  ;;  %v4253_v22 = vld [vmem:[%s7008_s7 + $0x58] sm:$0xff] }
 0x4c1   : > { %v2685_v39 = vadd.f32 %v2681_v28, %v2604_v37  ;;  %v5075_v40 = vpop.f32.mrb[31].mxu1  ;;  %v5082_v41 = vpop.f32.mrb[17].mxu0  ;;  %v4759_v37 = vld [vmem:[%s7006_s5 + $0x80] sm:$0xff]  ;;  %v4760_v28 = vld [vmem:[%s7006_s5 + $0x88] sm:$0xff] }
 0x4c2   : > { %v4762_v40 = vld [vmem:[%s7006_s5 + $0x98] sm:$0xff] }
 0x4c3   : > { %v2766_v42 = vadd.f32 %v2762_v38, %v2685_v39  ;;  %v5593_v38 = vpack.c.bf16 %v4760_v28, %v4759_v37  ;;  %v4761_v39 = vld [vmem:[%s7006_s5 + $0x90] sm:$0xff]  ;;  %v4255_v37 = vld [vmem:[%s7008_s7 + $0x68] sm:$0xff] }
 0x4c4   : > { %v2843_v43 = vpop.f32.mrb[32].mxu1  ;;  %v2924_v44 = vpop.f32.mrb[18].mxu0 }
 0x4c5   : > { %v2847_v47 = vadd.f32 %v2843_v43, %v2766_v42  ;;  %v5089_v48 = vpop.f32.mrb[33].mxu1  ;;  %v5096_v49 = vpop.f32.mrb[19].mxu0  ;;  %v5596_v43 = vpack.c.bf16 %v4762_v40, %v4761_v39  ;;  %v4333_v39 = vld [vmem:[%s7010_s9] sm:$0xff]  ;;  %v4334_v40 = vld [vmem:[%s7010_s9 + $0x8] sm:$0xff] }
 0x4c6   : > { %v4765_v49 = vld [vmem:[%s7006_s5 + $0xb0] sm:$0xff] }
 0x4c7   : > { %v2928_v10 = vadd.f32 %v2924_v44, %v2847_v47  ;;  %v4763_v44 = vld [vmem:[%s7006_s5 + $0xa0] sm:$0xff]  ;;  %v4764_v47 = vld [vmem:[%s7006_s5 + $0xa8] sm:$0xff] }
 0x4c8   : > { %v3005_v46 = vpop.f32.mrb[34].mxu1  ;;  %v3086_v51 = vpop.f32.mrb[20].mxu0  ;;  %v5599_v48 = vpack.c.bf16 %v4764_v47, %v4763_v44  ;;  %v4337_v47 = vld [vmem:[%s7010_s9 + $0x20] sm:$0xff] }
 0x4c9   : > { %v3009_v54 = vadd.f32 %v3005_v46, %v2928_v10  ;;  %v5103_v57 = vpop.f32.mrb[35].mxu1  ;;  %v5110_v63 = vpop.f32.mrb[21].mxu0  ;;  %v4766_v10 = vld [vmem:[%s7006_s5 + $0xb8] sm:$0xff] }
 0x4ca   : > { %v5602_v46 = vpack.c.bf16 %v4766_v10, %v4765_v49  ;;  %v4339_v10 = vld [vmem:[%s7010_s9 + $0x30] sm:$0xff] }
 0x4cb   : > { %v3090_v52 = vadd.f32 %v3086_v51, %v3009_v54  ;;  %v3909_v51 = vld [vmem:[%s7006_s5] sm:$0xff]  ;;  %v3910_v54 = vld [vmem:[%s7006_s5 + $0x8] sm:$0xff] }
 0x4cc   : > { %v3167_v53 = vpop.f32.mrb[36].mxu1  ;;  %v3248_v55 = vpop.f32.mrb[22].mxu0  ;;  %v5581_v63 = vpack.c.bf16 %v3910_v54, %v3909_v51 }
 0x4cd   : > { %v3171_v56 = vadd.f32 %v3167_v53, %v3090_v52  ;;  %v5117_v4 = vpop.f32.mrb[37].mxu1  ;;  %v5124_v58 = vpop.f32.mrb[23].mxu0 }
 0x4ce   : > { %v3912_v4 = vld [vmem:[%s7006_s5 + $0x18] sm:$0xff] }
 0x4cf   : > { %v3252_v60 = vadd.f32 %v3248_v55, %v3171_v56  ;;  %v3911_v56 = vld [vmem:[%s7006_s5 + $0x10] sm:$0xff] }
 0x4d0   : > { %v3329_v2 = vpop.f32.mrb[38].mxu1  ;;  %v3410_v3 = vpop.f32.mrb[24].mxu0  ;;  %v5584_v58 = vpack.c.bf16 %v3912_v4, %v3911_v56 }
 0x4d1   : > { %v3333_v8 = vadd.f32 %v3329_v2, %v3252_v60  ;;  %v5131_v6 = vpop.f32.mrb[39].mxu1  ;;  %v5138_v50 = vpop.f32.mrb[25].mxu0  ;;  %v3913_v60 = vld [vmem:[%s7006_s5 + $0x20] sm:$0xff]  ;;  %v3914_v2 = vld [vmem:[%s7006_s5 + $0x28] sm:$0xff] }
 0x4d2   : > { %v3916_v6 = vld [vmem:[%s7006_s5 + $0x38] sm:$0xff] }
 0x4d3   : > { %v3414_v9 = vadd.f32 %v3410_v3, %v3333_v8  ;;  %v5587_v3 = vpack.c.bf16 %v3914_v2, %v3913_v60  ;;  %v3915_v8 = vld [vmem:[%s7006_s5 + $0x30] sm:$0xff]  ;;  %v4239_v60 = vld [vmem:[%s7007_s6] sm:$0x1] }
 0x4d4   : > { %v3491_v11 = vpop.f32.mrb[40].mxu1  ;;  %v3572_v12 = vpop.f32.mrb[26].mxu0  ;;  %v5590_v50 = vpack.c.bf16 %v3916_v6, %v3915_v8 }
 0x4d5   : > { %v3495_v62 = vadd.f32 %v3491_v11, %v3414_v9  ;;  %v5145_v13 = vpop.f32.mrb[41].mxu1  ;;  %v5152_v14 = vpop.f32.mrb[27].mxu0  ;;  %v4768_v9 = vld [vmem:[%s7006_s5 + $0xc0] sm:$0xff]  ;;  %v4769_v11 = vld [vmem:[%s7006_s5 + $0xc8] sm:$0xff] }
 0x4d6   : > { %v4771_v13 = vld [vmem:[%s7006_s5 + $0xd8] sm:$0xff] }
 0x4d7   : > { %v3576_v15 = vadd.f32 %v3572_v12, %v3495_v62  ;;  %v5605_v12 = vpack.c.bf16 %v4769_v11, %v4768_v9  ;;  %v4770_v62 = vld [vmem:[%s7006_s5 + $0xd0] sm:$0xff] }
 0x4d8   : > { %v3653_v35 = vpop.f32.mrb[42].mxu1  ;;  %v3734_v0 = vpop.f32.mrb[28].mxu0  ;;  %v5608_v14 = vpack.c.bf16 %v4771_v13, %v4770_v62  ;;  %v4343_v11 = vld [vmem:[%s7010_s9 + $0x50] sm:$0xf] }
 0x4d9   : > { %v3657_v16 = vadd.f32 %v3653_v35, %v3576_v15  ;;  %v5159_v17 = vpop.f32.mrb[43].mxu1  ;;  %v5166_v18 = vpop.f32.mrb[29].mxu0  ;;  %v4772_v15 = vld [vmem:[%s7006_s5 + $0xe0] sm:$0xff]  ;;  %v4773_v35 = vld [vmem:[%s7006_s5 + $0xe8] sm:$0xff] }
 0x4da   : > { %v4775_v17 = vld [vmem:[%s7006_s5 + $0xf8] sm:$0xff] }
 0x4db   : > { %v3738_v20 = vadd.f32 %v3734_v0, %v3657_v16  ;;  %v5611_v0 = vpack.c.bf16 %v4773_v35, %v4772_v15  ;;  %v4774_v16 = vld [vmem:[%s7006_s5 + $0xf0] sm:$0xff] }
 0x4dc   : > { %v5614_v18 = vpack.c.bf16 %v4775_v17, %v4774_v16 }
 0x4dd   : > { %v3746_v24 = vadd.f32 %v4729_v19, %v3738_v20  ;;  %v4242_v20 = vld [vmem:[%s7008_s7] sm:$0xff] }
 0x4df   : > { %v3747_v25 = vmax.f32 %v3746_v24, 0.0  ;;  %v4243_v24 = vld [vmem:[%s7008_s7 + $0x8] sm:$0xff] }
 0x4e1   : > { %3749 = vrot.lane.b32.xlu1 %v3747_v25, %s5807_s26 }
 0x553   : > { %v3750_v26 = vpop.permute.xlu1 %3749 }
 0x554   : > { %v3752_v27 = vmax.f32 %v3747_v25, %v3750_v26  ;;  %v4244_v25 = vld [vmem:[%s7008_s7 + $0x10] sm:$0xff]  ;;  %v5617_v26 = vpack.c.bf16 %v4243_v24, %v4242_v20 }
 0x556   : > { %v3754_v29 = vrot.slane %v3752_v27, 1 }
 0x558   : > { %v3756_v30 = vmax.f32 %v3752_v27, %v3754_v29  ;;  %v4245_v27 = vld [vmem:[%s7008_s7 + $0x18] sm:$0xff] }
 0x559   : > { %v5620_v29 = vpack.c.bf16 %v4245_v27, %v4244_v25 }
 0x55a   : > { %5168 = vmatpush3.msk.msra.mxu1 %vm409_vm3, %v3756_v30  ;;  %vm7042_vm3 = vcmask 1039360   ;;  %v4246_v30 = vld [vmem:[%s7008_s7 + $0x20] sm:$0xff] }
 0x55b   : > { %5170 = vmatmul.mubr.msk.f32.vlgmr.msra.gmra.mrb[44].mxu1 %vm3757_vm5, %v6188_v45  ;;  %5568 = vmatprep.subr.bf16.mxu1 %v5808_v59  ;;  %v4752_v45 = vld [vmem:[%s7006_s5 + $0x58] sm:$0xff]  ;;  %v5623_v1 = vpack.c.bf16 %v4247_v61, %v4246_v30 }
 0x55c   : > { %5223 = vmatprep.mubr.msk.f32.mxu1 %vm5811_vm0, %v5805_v7  ;;  %5570 = vmatpush3.bf16.msra.mxu1 %v5569_v5  ;;  %v5572_v32 = vpack.c.bf16 %v4752_v45, %v4751_v31  ;;  %v4248_v5 = vld [vmem:[%s7008_s7 + $0x30] sm:$0xff]  ;;  %v4249_v31 = vld [vmem:[%s7008_s7 + $0x38] sm:$0xff] }
 0x55d   : > { %5571 = vmatprep.subr.bf16.mxu1 %v5808_v59  ;;  %v5626_v45 = vpack.c.bf16 %v4249_v31, %v4248_v5 }
 0x560   : > { %5573 = vmatpush3.bf16.msra.mxu1 %v5572_v32  ;;  %v4250_v32 = vld [vmem:[%s7008_s7 + $0x40] sm:$0xff] }
 0x561   : > { %5574 = vmatprep.subr.bf16.mxu1 %v5808_v59  ;;  %v5629_v34 = vpack.c.bf16 %v4251_v33, %v4250_v32 }
 0x564   : > { %5576 = vmatpush3.bf16.msra.mxu1 %v5575_v21  ;;  %v4252_v21 = vld [vmem:[%s7008_s7 + $0x50] sm:$0xff] }
 0x565   : > { %5577 = vmatprep.subr.bf16.mxu1 %v5808_v59  ;;  %v5632_v23 = vpack.c.bf16 %v4253_v22, %v4252_v21 }
 0x568   : > { %5579 = vmatpush3.bf16.msra.mxu1 %v5578_v36  ;;  %v4254_v36 = vld [vmem:[%s7008_s7 + $0x60] sm:$0xff] }
 0x569   : > { %5580 = vmatprep.subr.bf16.mxu1 %v5808_v59  ;;  %v5635_v28 = vpack.c.bf16 %v4255_v37, %v4254_v36 }
 0x62e   : > { %v3829_v41 = vpop.f32.mrb[44].mxu1 }
 0x62f   : > { %5205 = vmatmul.mubr.msk.f32.vlgmr.msra.gmra.mrb[30].mxu0 %vm7042_vm3, %v3829_v41  ;;  %v5171_v42 = vpop.f32.mrb[45].mxu1  ;;  %v4335_v41 = vld [vmem:[%s7010_s9 + $0x10] sm:$0xff] }
 0x630   : > { %5594 = vmatpush3.bf16.msra.mxu0 %v5593_v38  ;;  %5261 = vmatprep.mubr.msk.f32.mxu0 %vm5811_vm0, %v5805_v7  ;;  %v4256_v38 = vld [vmem:[%s7008_s7 + $0x70] sm:$0xff]  ;;  %v5638_v42 = vpack.c.bf16 %v4334_v40, %v4333_v39 }
 0x631   : > { %5595 = vmatprep.subr.bf16.mxu0 %v5808_v59 }
 0x634   : > { %5597 = vmatpush3.bf16.msra.mxu0 %v5596_v43  ;;  %v4336_v43 = vld [vmem:[%s7010_s9 + $0x18] sm:$0xff] }
 0x635   : > { %5598 = vmatprep.subr.bf16.mxu0 %v5808_v59  ;;  %v5641_v44 = vpack.c.bf16 %v4336_v43, %v4335_v41 }
 0x638   : > { %5600 = vmatpush3.bf16.msra.mxu0 %v5599_v48  ;;  %v4338_v48 = vld [vmem:[%s7010_s9 + $0x28] sm:$0xff] }
 0x639   : > { %5601 = vmatprep.subr.bf16.mxu0 %v5808_v59  ;;  %v5644_v49 = vpack.c.bf16 %v4338_v48, %v4337_v47 }
 0x63c   : > { %5603 = vmatpush3.bf16.msra.mxu0 %v5602_v46  ;;  %v4340_v46 = vld [vmem:[%s7010_s9 + $0x38] sm:$0xff] }
 0x63d   : > { %5616 = vmatprep.subr.bf16.mxu0 %v5808_v59  ;;  %v5647_v51 = vpack.c.bf16 %v4340_v46, %v4339_v10 }
 0x702   : > { %v3905_v57 = vpop.f32.mrb[30].mxu0 }
 0x703   : > { %v3927_v52 = vrot.slane %v3905_v57, 1  ;;  %v4082_v53 = vrot.slane %v3905_v57, 2  ;;  %v5206_v55 = vpop.f32.mrb[31].mxu0  ;;  %v4165_v19 = vrot.slane %v3905_v57, 3 }
 0x705   : > { %5224 = vmatmul.mubr.msk.f32.vlgmr.msra.gmra.mrb[46].mxu1 %vm3928_vm6, %v3927_v52  ;;  %5262 = vmatmul.mubr.msk.f32.vlgmr.msra.gmra.mrb[32].mxu0 %vm3928_vm6, %v4082_v53 }
 0x706   : > { %5582 = vmatpush3.bf16.msra.mxu1 %v5581_v63  ;;  %5242 = vmatprep.mubr.msk.f32.mxu1 %vm5811_vm0, %v5805_v7 }
 0x707   : > { %5583 = vmatprep.subr.bf16.mxu1 %v5808_v59  ;;  %5313 = vmatprep.mubr.msk.f32.mxu0 %vm5811_vm0, %v5805_v7 }
 0x708   : > { %5618 = vmatpush3.bf16.msra.mxu0 %v5617_v26 }
 0x709   : > { %5619 = vmatprep.subr.bf16.mxu0 %v5808_v59 }
 0x70a   : > { %5585 = vmatpush3.bf16.msra.mxu1 %v5584_v58 }
 0x70b   : > { %5586 = vmatprep.subr.bf16.mxu1 %v5808_v59 }
 0x70c   : > { %5621 = vmatpush3.bf16.msra.mxu0 %v5620_v29 }
 0x70d   : > { %5622 = vmatprep.subr.bf16.mxu0 %v5808_v59 }
 0x70e   : > { %5588 = vmatpush3.bf16.msra.mxu1 %v5587_v3 }
 0x70f   : > { %5589 = vmatprep.subr.bf16.mxu1 %v5808_v59 }
 0x710   : > { %5624 = vmatpush3.bf16.msra.mxu0 %v5623_v1 }
 0x711   : > { %5625 = vmatprep.subr.bf16.mxu0 %v5808_v59 }
 0x712   : > { %5591 = vmatpush3.bf16.msra.mxu1 %v5590_v50  ;;  %v4342_v50 = vld [vmem:[%s7010_s9 + $0x48] sm:$0xff] }
 0x713   : > { %5604 = vmatprep.subr.bf16.mxu1 %v5808_v59 }
 0x714   : > { %5627 = vmatpush3.bf16.msra.mxu0 %v5626_v45 }
 0x715   : > { %5243 = vmatmul.mubr.msk.f32.vlgmr.msra.gmra.mrb[48].mxu1 %vm3928_vm6, %v3905_v57  ;;  %5628 = vmatprep.subr.bf16.mxu0 %v5808_v59 }
 0x716   : > { %5606 = vmatpush3.bf16.msra.mxu1 %v5605_v12  ;;  %5280 = vmatprep.mubr.msk.f32.mxu1 %vm5811_vm0, %v5805_v7  ;;  %v4257_v12 = vld [vmem:[%s7009_s8] sm:$0x1] }
 0x717   : > { %5607 = vmatprep.subr.bf16.mxu1 %v5808_v59 }
 0x718   : > { %5630 = vmatpush3.bf16.msra.mxu0 %v5629_v34 }
 0x719   : > { %5631 = vmatprep.subr.bf16.mxu0 %v5808_v59 }
 0x71a   : > { %5609 = vmatpush3.bf16.msra.mxu1 %v5608_v14 }
 0x71b   : > { %5610 = vmatprep.subr.bf16.mxu1 %v5808_v59 }
 0x71c   : > { %5633 = vmatpush3.bf16.msra.mxu0 %v5632_v23 }
 0x71d   : > { %5634 = vmatprep.subr.bf16.mxu0 %v5808_v59 }
 0x71e   : > { %5612 = vmatpush3.bf16.msra.mxu1 %v5611_v0 }
 0x71f   : > { %5613 = vmatprep.subr.bf16.mxu1 %v5808_v59 }
 0x720   : > { %5636 = vmatpush3.bf16.msra.mxu0 %v5635_v28 }
 0x721   : > { %5311 = vmatprep.subr.mxu0 %v5805_v7 }
 0x722   : > { %5615 = vmatpush3.bf16.msra.mxu1 %v5614_v18 }
 0x723   : > { %5637 = vmatprep.subr.bf16.mxu1 %v5808_v59 }
 0x724   : > { %5312 = vmatpush3.msra.mxu0 %v4256_v38 }
 0x725   : > { %5281 = vmatmul.mubr.msk.f32.vlgmr.msra.gmra.mrb[50].mxu1 %vm3928_vm6, %v4165_v19 }
 0x726   : > { %5338 = vmatprep.mubr.msk.f32.mxu1 %vm5811_vm0, %v5805_v7  ;;  %5639 = vmatpush3.bf16.msra.mxu1 %v5638_v42 }
 0x727   : > { %5640 = vmatprep.subr.bf16.mxu1 %v5808_v59 }
 0x72a   : > { %5642 = vmatpush3.bf16.msra.mxu1 %v5641_v44 }
 0x72b   : > { %5643 = vmatprep.subr.bf16.mxu1 %v5808_v59 }
 0x72e   : > { %5645 = vmatpush3.bf16.msra.mxu1 %v5644_v49 }
 0x72f   : > { %5646 = vmatprep.subr.bf16.mxu1 %v5808_v59 }
 0x732   : > { %5648 = vmatpush3.bf16.msra.mxu1 %v5647_v51 }
 0x733   : > { %5649 = vmatprep.subr.bf16.mxu1 %v5808_v59  ;;  %v4341_v59 = vld [vmem:[%s7010_s9 + $0x40] sm:$0xff] }
 0x734   : > { %v5650_v9 = vpack.c.bf16 %v4342_v50, %v4341_v59 }
 0x736   : > { %5651 = vmatpush3.bf16.msra.mxu1 %v5650_v9 }
 0x737   : > { %5336 = vmatprep.subr.mxu1 %v5805_v7  ;;  %v4344_v7 = vld [vmem:[%s7011_s10] sm:$0x1] }
 0x73a   : > { %5337 = vmatpush3.msk.msra.mxu1 %vm7043_vm14, %v4343_v11 }
 0x7d8   : > { %v3997_v54 = vpop.f32.mrb[46].mxu1  ;;  %v4151_v57 = vpop.f32.mrb[32].mxu0 }
 0x7d9   : > { %v5225_v63 = vpop.f32.mrb[47].mxu1  ;;  %v5263_v52 = vpop.f32.mrb[33].mxu0 }
 0x7e8   : > { %v4069_v53 = vpop.f32.mrb[48].mxu1 }
 0x7e9   : > { %v4070_v55 = vadd.f32 %v4069_v53, %v3997_v54  ;;  %v5244_v56 = vpop.f32.mrb[49].mxu1 }
 0x7eb   : > { %v4155_v4 = vadd.f32 %v4151_v57, %v4070_v55 }
 0x7f8   : > { %v4234_v58 = vpop.f32.mrb[50].mxu1 }
 0x7f9   : > { %v4238_v2 = vadd.f32 %v4234_v58, %v4155_v4  ;;  %v5282_v3 = vpop.f32.mrb[51].mxu1 }
 0x7fb   : > { %v4240_v8 = vadd.f32 %v4239_v60, %v4238_v2 }
 0x7fd   : > { %v4241_v6 = vmax.f32 %v4240_v8, 0.0 }
 0x7ff   : > { %5314 = vmatmul.mubr.msk.f32.vlgmr.msra.gmra.mrb[34].mxu0 %vm4258_vm8, %v4241_v6 }
 0x8d2   : > { %v4328_v62 = vpop.f32.mrb[34].mxu0 }
 0x8d3   : > { %v4329_v13 = vadd.f32 %v4328_v62, %v4257_v12  ;;  %v5315_v14 = vpop.f32.mrb[35].mxu0 }
 0x8d5   : > { %v4332_v15 = vmax.f32 %v4329_v13, 0.0 }
 0x8d7   : > { %5339 = vmatmul.mubr.msk.f32.vlgmr.msra.gmra.mrb[52].mxu1 %vm4345_vm4, %v4332_v15 }
 0x9aa   : > { %v4418_v35 = vpop.f32.mrb[52].mxu1 }
 0x9ab   : > { %v4419_v0 = vadd.f32 %v4418_v35, %v4344_v7  ;;  %v5340_v16 = vpop.f32.mrb[53].mxu1 }
 0x9ad   : > { %v4423_v17 = vsel %vm4422_vm11, %v4419_v0, -inf }
 0x9ae   : > { %4424 = vmax.xlane.f32.xlu0 %v4423_v17 }
 0xa3b   : > { %v4425_v18 = vpop.xlane.xlu0 %4424 }
 0xa3c   : > { %v4426_v19 = vsub.f32 %v4419_v0, %v4425_v18 }
 0xa3e   : > { %v4427_v20 = vmul.f32 1.442695, %v4426_v19 }
 0xa40   : > { %5737 = vpow2.f32 %v4427_v20 }
 0xa4a   : > { %v5738_v24 = vpop.eup %5737 }
 0xa4b   : > { %v4429_v25 = vsel %vm4422_vm11, %v5738_v24, 0.0 }
 0xa4c   : > { %4430 = vadd.xlane.f32.xlu1 %v4429_v25 }
 0xad9   : > { %v4431_v26 = vpop.xlane.xlu1 %4430 }
 0xada   : > { %5739 = vlog2.f32 %v4431_v26 }
 0xae4   : > { %v5740_v27 = vpop.eup %5739 }
 0xae5   : > { %v4433_v29 = vmul.f32 0.6931472, %v5740_v27 }
 0xae7   : > { %v4434_v30 = vsub.f32 %v4426_v19, %v4433_v29 }
 0xae9   : > { %4435 = vst.msk [vmem:[%s378_s25] sm:$0x1] %vm4422_vm11, %v4434_v30 }
 0xaea   : > { %5754 = shalt.err (!%p5751_p3)
}
 0xaeb   : > { %s5755_s26 = scalar_lea.hbm %s6958_s15, 16  ;;  %s5759_s30 = scalar_lea.hbm %s7012_s11, 32 }
 0xaec   : > { %p5756_p4 = scmp.ne.s32.totalorder %s6958_s15, %s5755_s26  ;;  %p5760_p9 = scmp.lt.u32.totalorder %s6958_s15, %s7012_s11 }
 0xaed   : > { %p5761_p10 = scmp.lt.u32.totalorder %s5759_s30, %s5755_s26  ;;  %p5763_p12 = scmp.lt.u32.totalorder %s5755_s26, %s6958_s15 }
 0xaee   : > { %p5757_p7 = pnand %p5756_p4, %p5916_p5 }
 0xaef   : > { %p5762_p11 = por %p5761_p10, %p5760_p9 }
 0xaf0   : > { %p5758_p8 = pneg %p5757_p7 }
 0xaf1   : > { %p5764_p13 = por %p5763_p12, %p5762_p11 }
 0xaf3   : > { %p5765_p0 = pnand %p5764_p13, %p5758_p8 }
 0xaf5   : > { %5768 = shalt.err (!%p5765_p0)
}
 0xaf6   : > { %5676 = dma.vmem_to_hbm [thread:$0]  (%p5916_p5), %s6960_s12, 16, %s6958_s15, %s4437_s22  }
 0xaf7 PF: > { %p5682_p1 = scmp.ge.s32.totalorder %s5803_s20, 2  ;;  %s4461_s14 = sand.u32 1, %s5791_s17  }
 0xaf8   : > { %s4462_s24 = scalar_lea.sflag [#allocation3], %s4461_s14 }
 0xaf9   : > { %p5679_p2 = pnand %p5682_p1, %p5920_p6 }
 0xafb   : > { %5786 = dma.done.wait (!%p5679_p2), %s4462_s24, 16  }
 0xafc   : > { %5788 = vsyncadd (!%p5679_p2), %s4462_s24, 4294967280  ;;  %s7044_s20 = sld [smem:[#allocation6_spill]]  ;;  %s7045_s21 = sld [smem:[#allocation5_spill]] }
 0xafd   : > { %s7046_s19 = sld [smem:[#allocation7_spill]]  ;;  %s7047_s17 = smov %s5795_s18 }
 0xb02   : > { %p21_p3 = scmp.ge.s32.totalorder %s7044_s20, 4   ;;  %s7048_s18 = smov %s7045_s21 }
 0xb04   :  { %23 = sbr.rel (!%p21_p3) target bundleno = 3 (0x3), region = 135 }
 0xb0b   :  { %4466 = vsyncpa [#allocation3], 1 }
 0xb0c   :  { %4468 = vsyncpa [#allocation3 + $0x1], 1 }

</bundles_post_ra>
